<compile_context>
chip_gen: v5e
topology: v5e:2x2
jax: 0.10.0
libtpu: 0.0.40
codegen_flags: <defaults>
</compile_context>

<pallas_src>
import functools

import jax
import jax.numpy as jnp
from jax import lax
from jax.experimental import pallas as pl
from jax.experimental.pallas import tpu as pltpu

# MXU input dtype: bf16 (v5e/v6e/v7x MXUs are bf16-native; accumulation stays f32 via
# preferred_element_type).  Set to jnp.float32 for bit-closer parity with the f32
# PyTorch reference.
_MXU_DTYPE = jnp.bfloat16

_LN_EPS = 1e-5


def _vmem_limit_bytes():
    """Scoped VMEM budget: ~3/4 of physical, capped at 96 MiB.
    v5e/v6e (128 MiB physical) -> 96 MiB, v7x (64 MiB) -> 48 MiB.  Falls back to a
    conservative 48 MiB if the hardware query is unavailable."""
    try:
        cap = int(pltpu.get_tpu_info().vmem_capacity_bytes)
    except Exception:
        cap = 0
    if cap <= 0:
        return 48 * 1024 * 1024
    return int(max(min(cap * 3 // 4, 96 * 1024 * 1024), 32 * 1024 * 1024))


_VMEM_LIMIT_BYTES = _vmem_limit_bytes()

# Single-buffer pipelining hint for blocks whose index_map never changes (weights,
# biases, LN params): halves their VMEM footprint.  Falls back to the default
# double-buffered spec if this JAX version does not support pipeline_mode.
try:
    _BUFFERED_ONE = pl.Buffered(1)
except Exception:  # pragma: no cover
    _BUFFERED_ONE = None


def _const_spec(block_shape, index_map):
    if _BUFFERED_ONE is not None:
        try:
            return pl.BlockSpec(block_shape, index_map, pipeline_mode=_BUFFERED_ONE)
        except TypeError:
            pass
    return pl.BlockSpec(block_shape, index_map)


def _compiler_params(dimension_semantics):
    return pltpu.CompilerParams(
        dimension_semantics=dimension_semantics,
        vmem_limit_bytes=_VMEM_LIMIT_BYTES,
    )


def _pick_tile(dim, target):
    """Largest tile <= target dividing dim; multiples of 128 when actually tiling.
    TODO(synk): falls back to one full-dim block for awkward sizes (no ragged tiles)."""
    if dim <= target:
        return dim
    t = (target // 128) * 128
    while t >= 128:
        if dim % t == 0:
            return t
        t -= 128
    return dim


def _layer_norm(y, gamma, beta):
    """Centered two-pass LayerNorm (matches torch; avoids E[x^2]-mu^2 cancellation)."""
    mu = jnp.mean(y, axis=-1, keepdims=True)
    yc = y - mu
    var = jnp.mean(yc * yc, axis=-1, keepdims=True)
    yn = yc * lax.rsqrt(var + _LN_EPS)
    return yn * gamma + beta


# ---------------------------------------------------------------------------
# Tiled matmul + bias with f32 VMEM accumulator (projections)
# ---------------------------------------------------------------------------
def _matmul_bias_kernel(x_ref, w_ref, b_ref, o_ref, acc_ref):
    @pl.when(pl.program_id(2) == 0)
    def _():
        acc_ref[...] = jnp.zeros_like(acc_ref)

    acc_ref[...] += jnp.dot(
        x_ref[...].astype(_MXU_DTYPE),
        w_ref[...].astype(_MXU_DTYPE),
        preferred_element_type=jnp.float32,
    )

    @pl.when(pl.program_id(2) == pl.num_programs(2) - 1)
    def _():
        o_ref[...] = (acc_ref[...] + b_ref[...].astype(jnp.float32)).astype(o_ref.dtype)


def linear(x, w, b, tm=512, tn=512, tk=512):
    """y = x @ w + b, tiled over (M, N, K): M/N parallel, K reduction (accumulator)."""
    M, K = x.shape
    N = w.shape[1]
    tm, tn, tk = _pick_tile(M, tm), _pick_tile(N, tn), _pick_tile(K, tk)
    grid = (M // tm, N // tn, K // tk)
    return pl.pallas_call(
        _matmul_bias_kernel,
        out_shape=jax.ShapeDtypeStruct((M, N), x.dtype),
        grid_spec=pltpu.PrefetchScalarGridSpec(
            num_scalar_prefetch=0,
            grid=grid,
            in_specs=[
                pl.BlockSpec((tm, tk), lambda i, j, k: (i, k)),
                pl.BlockSpec((tk, tn), lambda i, j, k: (k, j)),
                pl.BlockSpec((1, tn), lambda i, j, k: (0, j)),
            ],
            out_specs=pl.BlockSpec((tm, tn), lambda i, j, k: (i, j)),
            scratch_shapes=[pltpu.VMEM((tm, tn), jnp.float32)],
        ),
        compiler_params=_compiler_params(("parallel", "parallel", "arbitrary")),
    )(x, w, b.reshape(1, N))


# ---------------------------------------------------------------------------
# Fused multi-head attention + output projection + residual + LayerNorm
#   grid = (batch, query-tile, head); the head axis is an on-chip reduction:
#   each step does one head's attention and accumulates its partial output
#   projection (ctx_h @ wo[h]) into an f32 VMEM scratch.  Residual + LayerNorm
#   run in the epilogue on the last head.
# ---------------------------------------------------------------------------
def _attention_kernel(*refs, sm_scale, has_mask):
    if has_mask:
        (q_ref, k_ref, v_ref, mask_ref, wo_ref, bo_ref, res_ref,
         g_ref, beta_ref, o_ref, acc_ref) = refs
    else:
        (q_ref, k_ref, v_ref, wo_ref, bo_ref, res_ref,
         g_ref, beta_ref, o_ref, acc_ref) = refs
        mask_ref = None

    h = pl.program_id(2)

    @pl.when(h == 0)
    def _():
        acc_ref[...] = jnp.zeros_like(acc_ref)

    # Whole-head loads via a dynamic leading index (no lane slicing / concat).
    q = (q_ref[h].astype(jnp.float32) * sm_scale).astype(_MXU_DTYPE)   # (tq, Dh)
    k = k_ref[h].astype(_MXU_DTYPE)                                    # (Sk, Dh)
    v = v_ref[h].astype(_MXU_DTYPE)                                    # (Sk, Dh)

    # q @ k^T without materializing a transpose: contract last dims directly.
    s = lax.dot_general(q, k, (((1,), (1,)), ((), ())),
                        preferred_element_type=jnp.float32)            # (tq, Sk)
    if mask_ref is not None:
        s = s + mask_ref[...].astype(jnp.float32)
    s = s - jnp.max(s, axis=-1, keepdims=True)
    p = jnp.exp(s)
    p = p / jnp.sum(p, axis=-1, keepdims=True)       # exact softmax (parity w/ torch)

    ctx = jnp.dot(p.astype(_MXU_DTYPE), v, preferred_element_type=jnp.float32)  # (tq, Dh)
    # per-head partial output projection: sum_h ctx_h @ wo[h] == concat(ctx) @ wo
    acc_ref[...] += jnp.dot(ctx.astype(_MXU_DTYPE), wo_ref[h].astype(_MXU_DTYPE),
                            preferred_element_type=jnp.float32)

    @pl.when(h == pl.num_programs(2) - 1)
    def _():
        y = acc_ref[...] + bo_ref[...].astype(jnp.float32) + res_ref[...].astype(jnp.float32)
        o_ref[...] = _layer_norm(
            y, g_ref[...].astype(jnp.float32), beta_ref[...].astype(jnp.float32)
        ).astype(o_ref.dtype)


def attention_block(q, k, v, mask, residual, wo_heads, bo, gamma, beta, tq=256):
    """q/k/v: (B, H, S[k], Dh) head-major.  wo_heads: (H, Dh, E).  mask: (S, Sk) or None."""
    B, H, S, Dh = q.shape
    Sk = k.shape[2]
    E = H * Dh
    tq = _pick_tile(S, tq)
    grid = (B, S // tq, H)
    sm_scale = 1.0 / (Dh ** 0.5)

    in_specs = [
        pl.BlockSpec((None, H, tq, Dh), lambda b, qi, h: (b, 0, qi, 0)),
        pl.BlockSpec((None, H, Sk, Dh), lambda b, qi, h: (b, 0, 0, 0)),
        pl.BlockSpec((None, H, Sk, Dh), lambda b, qi, h: (b, 0, 0, 0)),
    ]
    args = [q, k, v]
    if mask is not None:
        in_specs.append(pl.BlockSpec((tq, Sk), lambda b, qi, h: (qi, 0)))
        args.append(mask)
    in_specs += [
        _const_spec((H, Dh, E), lambda b, qi, h: (0, 0, 0)),
        _const_spec((1, E), lambda b, qi, h: (0, 0)),
        pl.BlockSpec((None, tq, E), lambda b, qi, h: (b, qi, 0)),
        _const_spec((1, E), lambda b, qi, h: (0, 0)),
        _const_spec((1, E), lambda b, qi, h: (0, 0)),
    ]
    args += [wo_heads, bo.reshape(1, E), residual,
             gamma.reshape(1, E), beta.reshape(1, E)]

    kernel = functools.partial(_attention_kernel, sm_scale=sm_scale,
                               has_mask=mask is not None)
    return pl.pallas_call(
        kernel,
        out_shape=jax.ShapeDtypeStruct((B, S, E), residual.dtype),
        grid_spec=pltpu.PrefetchScalarGridSpec(
            num_scalar_prefetch=0,
            grid=grid,
            in_specs=in_specs,
            out_specs=pl.BlockSpec((None, tq, E), lambda b, qi, h: (b, qi, 0)),
            scratch_shapes=[pltpu.VMEM((tq, E), jnp.float32)],
        ),
        compiler_params=_compiler_params(("parallel", "parallel", "arbitrary")),
    )(*args)


# ---------------------------------------------------------------------------
# Fused FFN (linear -> ReLU -> linear) + residual + LayerNorm, hidden dim tiled
# as a reduction axis with an f32 VMEM accumulator (weights are never fully
# resident -> fits v7x's 64 MiB VMEM at realistic E/hidden).
# ---------------------------------------------------------------------------
def _ffn_kernel(x_ref, w1_ref, b1_ref, w2_ref, b2_ref, g_ref, beta_ref, o_ref, acc_ref):
    j = pl.program_id(1)

    @pl.when(j == 0)
    def _():
        acc_ref[...] = jnp.zeros_like(acc_ref)

    x = x_ref[...]
    hid = jnp.dot(x.astype(_MXU_DTYPE), w1_ref[...].astype(_MXU_DTYPE),
                  preferred_element_type=jnp.float32) + b1_ref[...].astype(jnp.float32)
    hid = jnp.maximum(hid, 0.0)                      # hidden block stays on-chip
    acc_ref[...] += jnp.dot(hid.astype(_MXU_DTYPE), w2_ref[...].astype(_MXU_DTYPE),
                            preferred_element_type=jnp.float32)

    @pl.when(j == pl.num_programs(1) - 1)
    def _():
        y = acc_ref[...] + b2_ref[...].astype(jnp.float32) + x.astype(jnp.float32)
        o_ref[...] = _layer_norm(
            y, g_ref[...].astype(jnp.float32), beta_ref[...].astype(jnp.float32)
        ).astype(o_ref.dtype)


def ffn_block(x, w1, b1, w2, b2, gamma, beta, tm=256, th=512):
    B, S, E = x.shape
    M = B * S
    Hf = w1.shape[1]
    tm = _pick_tile(M, tm)
    th = _pick_tile(Hf, th)
    grid = (M // tm, Hf // th)
    out = pl.pallas_call(
        _ffn_kernel,
        out_shape=jax.ShapeDtypeStruct((M, E), x.dtype),
        grid_spec=pltpu.PrefetchScalarGridSpec(
            num_scalar_prefetch=0,
            grid=grid,
            in_specs=[
                pl.BlockSpec((tm, E), lambda i, j: (i, 0)),
                pl.BlockSpec((E, th), lambda i, j: (0, j)),
                pl.BlockSpec((1, th), lambda i, j: (0, j)),
                pl.BlockSpec((th, E), lambda i, j: (j, 0)),
                _const_spec((1, E), lambda i, j: (0, 0)),
                _const_spec((1, E), lambda i, j: (0, 0)),
                _const_spec((1, E), lambda i, j: (0, 0)),
            ],
            out_specs=pl.BlockSpec((tm, E), lambda i, j: (i, 0)),
            scratch_shapes=[pltpu.VMEM((tm, E), jnp.float32)],
        ),
        compiler_params=_compiler_params(("parallel", "arbitrary")),
    )(x.reshape(M, E), w1, b1.reshape(1, Hf), w2, b2.reshape(1, E),
      gamma.reshape(1, E), beta.reshape(1, E))
    return out.reshape(B, S, E)


# ---------------------------------------------------------------------------
# Model pieces
# ---------------------------------------------------------------------------
def stochastic_decoder_layer(tgt, memory, tgt_mask, p, num_heads):
    B, S, E = tgt.shape
    Sk = memory.shape[1]
    H = num_heads
    Dh = E // H

    # ---- masked self-attention block --------------------------------------
    qkv = linear(tgt.reshape(B * S, E), p["self_wqkv"], p["self_bqkv"])
    # head-major split (3, B, H, S, Dh): one XLA transpose so the attention kernel
    # indexes whole heads along a leading block axis.
    # TODO(synk): fuse this projection + head split into the attention kernel to
    # avoid the HBM round trip of the qkv activation.
    qkv = qkv.reshape(B, S, 3, H, Dh).transpose(2, 0, 3, 1, 4)
    x = attention_block(qkv[0], qkv[1], qkv[2], tgt_mask, tgt,
                        p["self_wo_heads"], p["self_bo"], p["ln1_g"], p["ln1_b"])

    # ---- cross-attention block ---------------------------------------------
    q = linear(x.reshape(B * S, E), p["cross_wq"], p["cross_bq"])
    q = q.reshape(B, S, H, Dh).transpose(0, 2, 1, 3)
    kv = linear(memory.reshape(B * Sk, E), p["cross_wkv"], p["cross_bkv"])
    kv = kv.reshape(B, Sk, 2, H, Dh).transpose(2, 0, 3, 1, 4)
    # cross-attention carries no mask in the reference layer (memory_mask unused)
    x2 = attention_block(q, kv[0], kv[1], None, x,
                         p["cross_wo_heads"], p["cross_bo"], p["ln2_g"], p["ln2_b"])

    # ---- feed-forward block -------------------------------------------------
    x3 = ffn_block(x2, p["w1"], p["b1"], p["w2"], p["b2"], p["ln3_g"], p["ln3_b"])
    # TODO(synk): dropout / stochastic depth are identity here (inference mode).
    return x3


def decoder_stochastic(tgt, encoder_output, tgt_mask, params, num_heads):
    x = tgt
    for layer_params in params["layers"]:
        x = stochastic_decoder_layer(x, encoder_output, tgt_mask, layer_params, num_heads)
    return x


# ---------------------------------------------------------------------------
# Deterministic parameter initialization (synthetic, no checkpoint)
# ---------------------------------------------------------------------------
def _init_layer(key, E, H, hidden):
    ks = jax.random.split(key, 7)
    scale = 0.02
    Dh = E // H

    def w(k, shape):
        return scale * jax.random.normal(k, shape, jnp.float32)

    zE = jnp.zeros((E,), jnp.float32)
    return {
        # fused QKV / KV projection weights (one-time prep, equivalent to
        # concatenating separate PyTorch projection weights along out-features).
        "self_wqkv": w(ks[0], (E, 3 * E)),
        "self_bqkv": jnp.zeros((3 * E,), jnp.float32),
        # output projections stored head-major (H, Dh, E): one-time param prep so
        # the attention kernel can index whole heads along the leading axis.
        "self_wo_heads": w(ks[1], (E, E)).reshape(H, Dh, E),
        "self_bo": zE,
        "cross_wq": w(ks[2], (E, E)),
        "cross_bq": zE,
        "cross_wkv": w(ks[3], (E, 2 * E)),
        "cross_bkv": jnp.zeros((2 * E,), jnp.float32),
        "cross_wo_heads": w(ks[4], (E, E)).reshape(H, Dh, E),
        "cross_bo": zE,
        "w1": w(ks[5], (E, hidden)),
        "b1": jnp.zeros((hidden,), jnp.float32),
        "w2": w(ks[6], (hidden, E)),
        "b2": zE,
        "ln1_g": jnp.ones((E,), jnp.float32), "ln1_b": zE,
        "ln2_g": jnp.ones((E,), jnp.float32), "ln2_b": zE,
        "ln3_g": jnp.ones((E,), jnp.float32), "ln3_b": zE,
    }


def init_params(key, num_layers, E, num_heads, hidden):
    keys = jax.random.split(key, num_layers)
    return {"layers": [_init_layer(k, E, num_heads, hidden) for k in keys]}


# ---------------------------------------------------------------------------
if __name__ == "__main__":
    num_layers = 2
    embed_dim = 32
    num_heads = 4
    hidden_dim = 64
    B, S_tgt, S_src = 2, 8, 8

    key = jax.random.PRNGKey(0)
    k_tgt, k_mem, k_par = jax.random.split(key, 3)

    tgt = jax.random.normal(k_tgt, (B, S_tgt, embed_dim), jnp.float32)
    encoder_output = jax.random.normal(k_mem, (B, S_src, embed_dim), jnp.float32)
    # causal additive mask (0 where allowed, -1e9 where masked)
    causal = jnp.tril(jnp.ones((S_tgt, S_tgt), bool))
    tgt_mask = jnp.where(causal, 0.0, -1e9).astype(jnp.float32)

    params = init_params(k_par, num_layers, embed_dim, num_heads, hidden_dim)

    forward = jax.jit(
        lambda t, m, msk, prm: decoder_stochastic(t, m, msk, prm, num_heads)
    )
    out = forward(tgt, encoder_output, tgt_mask, params)
    jax.block_until_ready(out)
    assert out.shape == (B, S_tgt, embed_dim)
    print("KERNEL_OK")
</pallas_src>

<mosaic_0001>
module attributes {stable_mosaic.version = 11 : i64} {
  func.func @_matmul_bias_kernel(%arg0: i32, %arg1: i32, %arg2: i32, %arg3: memref<16x32xf32, #tpu.memory_space<vmem>>, %arg4: memref<32x96xf32, #tpu.memory_space<vmem>>, %arg5: memref<1x96xf32, #tpu.memory_space<vmem>>, %arg6: memref<16x96xf32, #tpu.memory_space<vmem>>, %arg7: memref<16x96xf32, #tpu.memory_space<vmem>>) attributes {dimension_semantics = [#tpu.dimension_semantics<parallel>, #tpu.dimension_semantics<parallel>, #tpu.dimension_semantics<arbitrary>], iteration_bounds = array<i64: 1, 1, 1>, scalar_prefetch = 0 : i64, scratch_operands = 1 : i64, tpu.core_type = #tpu.core_type<tc>, window_params = [{transform_indices = @transform_0, window_bounds = array<i64: 16, 32>}, {transform_indices = @transform_1, window_bounds = array<i64: 32, 96>}, {transform_indices = @transform_2, window_bounds = array<i64: 1, 96>}, {transform_indices = @transform_3, window_bounds = array<i64: 16, 96>}]} {
    %c0_i32 = arith.constant 0 : i32
    %0 = arith.cmpi eq, %arg2, %c0_i32 : i32
    %1 = arith.extui %0 : i1 to i32
    %c0_i32_0 = arith.constant 0 : i32
    %2 = arith.cmpi ne, %1, %c0_i32_0 : i32
    scf.if %2 {
      %cst_10 = arith.constant 0.000000e+00 : f32
      %14 = vector.broadcast %cst_10 : f32 to vector<16x96xf32>
      %c0_11 = arith.constant 0 : index
      %c0_12 = arith.constant 0 : index
      %15 = vector.load %arg7[%c0_11, %c0_12] : memref<16x96xf32, #tpu.memory_space<vmem>>, vector<16x96xf32>
      tpu.vector_store %arg7[%c0_11, %c0_12], %14 {strides = array<i32>} : memref<16x96xf32, #tpu.memory_space<vmem>>, vector<16x96xf32>,
    } else {
    }
    %c0 = arith.constant 0 : index
    %c0_1 = arith.constant 0 : index
    %3 = vector.load %arg7[%c0, %c0_1] : memref<16x96xf32, #tpu.memory_space<vmem>>, vector<16x96xf32>
    %c0_2 = arith.constant 0 : index
    %c0_3 = arith.constant 0 : index
    %4 = vector.load %arg3[%c0_2, %c0_3] : memref<16x32xf32, #tpu.memory_space<vmem>>, vector<16x32xf32>
    %5 = arith.truncf %4 : vector<16x32xf32> to vector<16x32xbf16>
    %c0_4 = arith.constant 0 : index
    %c0_5 = arith.constant 0 : index
    %6 = vector.load %arg4[%c0_4, %c0_5] : memref<32x96xf32, #tpu.memory_space<vmem>>, vector<32x96xf32>
    %7 = arith.truncf %6 : vector<32x96xf32> to vector<32x96xbf16>
    %cst = arith.constant dense<0.000000e+00> : vector<16x96xf32>
    %8 = tpu.matmul %5, %7, %cst {dimension_numbers = #tpu.dot_dimension_numbers<[1], [0], [0], [1], [0, 0, 1, 1], [], []>} : vector<16x32xbf16>, vector<32x96xbf16>, vector<16x96xf32> -> vector<16x96xf32>
    %9 = arith.addf %3, %8 : vector<16x96xf32>
    %c0_6 = arith.constant 0 : index
    %c0_7 = arith.constant 0 : index
    %10 = vector.load %arg7[%c0_6, %c0_7] : memref<16x96xf32, #tpu.memory_space<vmem>>, vector<16x96xf32>
    tpu.vector_store %arg7[%c0_6, %c0_7], %9 {strides = array<i32>} : memref<16x96xf32, #tpu.memory_space<vmem>>, vector<16x96xf32>,
    %c0_i32_8 = arith.constant 0 : i32
    %11 = arith.cmpi eq, %arg2, %c0_i32_8 : i32
    %12 = arith.extui %11 : i1 to i32
    %c0_i32_9 = arith.constant 0 : i32
    %13 = arith.cmpi ne, %12, %c0_i32_9 : i32
    scf.if %13 {
      %c0_10 = arith.constant 0 : index
      %c0_11 = arith.constant 0 : index
      %14 = vector.load %arg7[%c0_10, %c0_11] : memref<16x96xf32, #tpu.memory_space<vmem>>, vector<16x96xf32>
      %c0_12 = arith.constant 0 : index
      %c0_13 = arith.constant 0 : index
      %15 = vector.load %arg5[%c0_12, %c0_13] : memref<1x96xf32, #tpu.memory_space<vmem>>, vector<1x96xf32>
      %16 = vector.broadcast %15 : vector<1x96xf32> to vector<16x96xf32>
      %17 = arith.addf %14, %16 : vector<16x96xf32>
      %c0_14 = arith.constant 0 : index
      %c0_15 = arith.constant 0 : index
      %18 = vector.load %arg6[%c0_14, %c0_15] : memref<16x96xf32, #tpu.memory_space<vmem>>, vector<16x96xf32>
      tpu.vector_store %arg6[%c0_14, %c0_15], %17 {strides = array<i32>} : memref<16x96xf32, #tpu.memory_space<vmem>>, vector<16x96xf32>,
    } else {
    }
    return
  }
  func.func @transform_0(%arg0: i32, %arg1: i32, %arg2: i32) -> (i32, i32) {
    %c0_i32 = arith.constant 0 : i32
    return %arg0, %arg2 : i32, i32
  }
  func.func @transform_1(%arg0: i32, %arg1: i32, %arg2: i32) -> (i32, i32) {
    %c0_i32 = arith.constant 0 : i32
    return %arg2, %arg1 : i32, i32
  }
  func.func @transform_2(%arg0: i32, %arg1: i32, %arg2: i32) -> (i32, i32) {
    %c0_i32 = arith.constant 0 : i32
    %c0_i32_0 = arith.constant 0 : i32
    return %c0_i32, %arg1 : i32, i32
  }
  func.func @transform_3(%arg0: i32, %arg1: i32, %arg2: i32) -> (i32, i32) {
    %c0_i32 = arith.constant 0 : i32
    return %arg0, %arg1 : i32, i32
  }
}

module attributes {stable_mosaic.version = 11 : i64} {
  func.func @_matmul_bias_kernel(%arg0: i32, %arg1: i32, %arg2: i32, %arg3: memref<16x32xf32, #tpu.memory_space<vmem>>, %arg4: memref<32x32xf32, #tpu.memory_space<vmem>>, %arg5: memref<1x32xf32, #tpu.memory_space<vmem>>, %arg6: memref<16x32xf32, #tpu.memory_space<vmem>>, %arg7: memref<16x32xf32, #tpu.memory_space<vmem>>) attributes {dimension_semantics = [#tpu.dimension_semantics<parallel>, #tpu.dimension_semantics<parallel>, #tpu.dimension_semantics<arbitrary>], iteration_bounds = array<i64: 1, 1, 1>, scalar_prefetch = 0 : i64, scratch_operands = 1 : i64, tpu.core_type = #tpu.core_type<tc>, window_params = [{transform_indices = @transform_0, window_bounds = array<i64: 16, 32>}, {transform_indices = @transform_1, window_bounds = array<i64: 32, 32>}, {transform_indices = @transform_2, window_bounds = array<i64: 1, 32>}, {transform_indices = @transform_3, window_bounds = array<i64: 16, 32>}]} {
    %c0_i32 = arith.constant 0 : i32
    %0 = arith.cmpi eq, %arg2, %c0_i32 : i32
    %1 = arith.extui %0 : i1 to i32
    %c0_i32_0 = arith.constant 0 : i32
    %2 = arith.cmpi ne, %1, %c0_i32_0 : i32
    scf.if %2 {
      %cst_10 = arith.constant 0.000000e+00 : f32
      %14 = vector.broadcast %cst_10 : f32 to vector<16x32xf32>
      %c0_11 = arith.constant 0 : index
      %c0_12 = arith.constant 0 : index
      %15 = vector.load %arg7[%c0_11, %c0_12] : memref<16x32xf32, #tpu.memory_space<vmem>>, vector<16x32xf32>
      tpu.vector_store %arg7[%c0_11, %c0_12], %14 {strides = array<i32>} : memref<16x32xf32, #tpu.memory_space<vmem>>, vector<16x32xf32>,
    } else {
    }
    %c0 = arith.constant 0 : index
    %c0_1 = arith.constant 0 : index
    %3 = vector.load %arg7[%c0, %c0_1] : memref<16x32xf32, #tpu.memory_space<vmem>>, vector<16x32xf32>
    %c0_2 = arith.constant 0 : index
    %c0_3 = arith.constant 0 : index
    %4 = vector.load %arg3[%c0_2, %c0_3] : memref<16x32xf32, #tpu.memory_space<vmem>>, vector<16x32xf32>
    %5 = arith.truncf %4 : vector<16x32xf32> to vector<16x32xbf16>
    %c0_4 = arith.constant 0 : index
    %c0_5 = arith.constant 0 : index
    %6 = vector.load %arg4[%c0_4, %c0_5] : memref<32x32xf32, #tpu.memory_space<vmem>>, vector<32x32xf32>
    %7 = arith.truncf %6 : vector<32x32xf32> to vector<32x32xbf16>
    %cst = arith.constant dense<0.000000e+00> : vector<16x32xf32>
    %8 = tpu.matmul %5, %7, %cst {dimension_numbers = #tpu.dot_dimension_numbers<[1], [0], [0], [1], [0, 0, 1, 1], [], []>} : vector<16x32xbf16>, vector<32x32xbf16>, vector<16x32xf32> -> vector<16x32xf32>
    %9 = arith.addf %3, %8 : vector<16x32xf32>
    %c0_6 = arith.constant 0 : index
    %c0_7 = arith.constant 0 : index
    %10 = vector.load %arg7[%c0_6, %c0_7] : memref<16x32xf32, #tpu.memory_space<vmem>>, vector<16x32xf32>
    tpu.vector_store %arg7[%c0_6, %c0_7], %9 {strides = array<i32>} : memref<16x32xf32, #tpu.memory_space<vmem>>, vector<16x32xf32>,
    %c0_i32_8 = arith.constant 0 : i32
    %11 = arith.cmpi eq, %arg2, %c0_i32_8 : i32
    %12 = arith.extui %11 : i1 to i32
    %c0_i32_9 = arith.constant 0 : i32
    %13 = arith.cmpi ne, %12, %c0_i32_9 : i32
    scf.if %13 {
      %c0_10 = arith.constant 0 : index
      %c0_11 = arith.constant 0 : index
      %14 = vector.load %arg7[%c0_10, %c0_11] : memref<16x32xf32, #tpu.memory_space<vmem>>, vector<16x32xf32>
      %c0_12 = arith.constant 0 : index
      %c0_13 = arith.constant 0 : index
      %15 = vector.load %arg5[%c0_12, %c0_13] : memref<1x32xf32, #tpu.memory_space<vmem>>, vector<1x32xf32>
      %16 = vector.broadcast %15 : vector<1x32xf32> to vector<16x32xf32>
      %17 = arith.addf %14, %16 : vector<16x32xf32>
      %c0_14 = arith.constant 0 : index
      %c0_15 = arith.constant 0 : index
      %18 = vector.load %arg6[%c0_14, %c0_15] : memref<16x32xf32, #tpu.memory_space<vmem>>, vector<16x32xf32>
      tpu.vector_store %arg6[%c0_14, %c0_15], %17 {strides = array<i32>} : memref<16x32xf32, #tpu.memory_space<vmem>>, vector<16x32xf32>,
    } else {
    }
    return
  }
  func.func @transform_0(%arg0: i32, %arg1: i32, %arg2: i32) -> (i32, i32) {
    %c0_i32 = arith.constant 0 : i32
    return %arg0, %arg2 : i32, i32
  }
  func.func @transform_1(%arg0: i32, %arg1: i32, %arg2: i32) -> (i32, i32) {
    %c0_i32 = arith.constant 0 : i32
    return %arg2, %arg1 : i32, i32
  }
  func.func @transform_2(%arg0: i32, %arg1: i32, %arg2: i32) -> (i32, i32) {
    %c0_i32 = arith.constant 0 : i32
    %c0_i32_0 = arith.constant 0 : i32
    return %c0_i32, %arg1 : i32, i32
  }
  func.func @transform_3(%arg0: i32, %arg1: i32, %arg2: i32) -> (i32, i32) {
    %c0_i32 = arith.constant 0 : i32
    return %arg0, %arg1 : i32, i32
  }
}

module attributes {stable_mosaic.version = 11 : i64} {
  func.func @_attention_kernel(%arg0: i32, %arg1: i32, %arg2: i32, %arg3: memref<1x4x8x8xf32, #tpu.memory_space<vmem>>, %arg4: memref<1x4x8x8xf32, #tpu.memory_space<vmem>>, %arg5: memref<1x4x8x8xf32, #tpu.memory_space<vmem>>, %arg6: memref<8x8xf32, #tpu.memory_space<vmem>>, %arg7: memref<4x8x32xf32, #tpu.memory_space<vmem>>, %arg8: memref<1x32xf32, #tpu.memory_space<vmem>>, %arg9: memref<1x8x32xf32, #tpu.memory_space<vmem>>, %arg10: memref<1x32xf32, #tpu.memory_space<vmem>>, %arg11: memref<1x32xf32, #tpu.memory_space<vmem>>, %arg12: memref<1x8x32xf32, #tpu.memory_space<vmem>>, %arg13: memref<8x32xf32, #tpu.memory_space<vmem>>) attributes {dimension_semantics = [#tpu.dimension_semantics<parallel>, #tpu.dimension_semantics<parallel>, #tpu.dimension_semantics<arbitrary>], iteration_bounds = array<i64: 2, 1, 4>, scalar_prefetch = 0 : i64, scratch_operands = 1 : i64, tpu.core_type = #tpu.core_type<tc>, window_params = [{transform_indices = @transform_0, window_bounds = array<i64: 1, 4, 8, 8>}, {transform_indices = @transform_1, window_bounds = array<i64: 1, 4, 8, 8>}, {transform_indices = @transform_2, window_bounds = array<i64: 1, 4, 8, 8>}, {transform_indices = @transform_3, window_bounds = array<i64: 8, 8>}, {pipeline_mode = #tpu.pipeline_mode<synchronous>, transform_indices = @transform_4, window_bounds = array<i64: 4, 8, 32>}, {pipeline_mode = #tpu.pipeline_mode<synchronous>, transform_indices = @transform_5, window_bounds = array<i64: 1, 32>}, {transform_indices = @transform_6, window_bounds = array<i64: 1, 8, 32>}, {pipeline_mode = #tpu.pipeline_mode<synchronous>, transform_indices = @transform_7, window_bounds = array<i64: 1, 32>}, {pipeline_mode = #tpu.pipeline_mode<synchronous>, transform_indices = @transform_8, window_bounds = array<i64: 1, 32>}, {transform_indices = @transform_9, window_bounds = array<i64: 1, 8, 32>}]} {
    %c0_i32 = arith.constant 0 : i32
    %0 = arith.cmpi eq, %arg2, %c0_i32 : i32
    %1 = arith.extui %0 : i1 to i32
    %c0_i32_0 = arith.constant 0 : i32
    %2 = arith.cmpi ne, %1, %c0_i32_0 : i32
    scf.if %2 {
      %cst_23 = arith.constant 0.000000e+00 : f32
      %43 = vector.broadcast %cst_23 : f32 to vector<8x32xf32>
      %c0_24 = arith.constant 0 : index
      %c0_25 = arith.constant 0 : index
      %44 = vector.load %arg13[%c0_24, %c0_25] : memref<8x32xf32, #tpu.memory_space<vmem>>, vector<8x32xf32>
      tpu.vector_store %arg13[%c0_24, %c0_25], %43 {strides = array<i32>} : memref<8x32xf32, #tpu.memory_space<vmem>>, vector<8x32xf32>,
    } else {
    }
    %c0 = arith.constant 0 : index
    %3 = arith.index_cast %arg2 : i32 to index
    %c0_1 = arith.constant 0 : index
    %c0_2 = arith.constant 0 : index
    %4 = vector.load %arg3[%c0, %3, %c0_1, %c0_2] : memref<1x4x8x8xf32, #tpu.memory_space<vmem>>, vector<1x1x8x8xf32>
    %5 = vector.shape_cast %4 : vector<1x1x8x8xf32> to vector<8x8xf32>
    %cst = arith.constant 0.353553385 : f32
    %6 = vector.broadcast %cst : f32 to vector<8x8xf32>
    %7 = arith.mulf %5, %6 : vector<8x8xf32>
    %8 = arith.truncf %7 : vector<8x8xf32> to vector<8x8xbf16>
    %c0_3 = arith.constant 0 : index
    %9 = arith.index_cast %arg2 : i32 to index
    %c0_4 = arith.constant 0 : index
    %c0_5 = arith.constant 0 : index
    %10 = vector.load %arg4[%c0_3, %9, %c0_4, %c0_5] : memref<1x4x8x8xf32, #tpu.memory_space<vmem>>, vector<1x1x8x8xf32>
    %11 = vector.shape_cast %10 : vector<1x1x8x8xf32> to vector<8x8xf32>
    %12 = arith.truncf %11 : vector<8x8xf32> to vector<8x8xbf16>
    %c0_6 = arith.constant 0 : index
    %13 = arith.index_cast %arg2 : i32 to index
    %c0_7 = arith.constant 0 : index
    %c0_8 = arith.constant 0 : index
    %14 = vector.load %arg5[%c0_6, %13, %c0_7, %c0_8] : memref<1x4x8x8xf32, #tpu.memory_space<vmem>>, vector<1x1x8x8xf32>
    %15 = vector.shape_cast %14 : vector<1x1x8x8xf32> to vector<8x8xf32>
    %16 = arith.truncf %15 : vector<8x8xf32> to vector<8x8xbf16>
    %cst_9 = arith.constant dense<0.000000e+00> : vector<8x8xf32>
    %17 = tpu.matmul %8, %12, %cst_9 {dimension_numbers = #tpu.dot_dimension_numbers<[1], [1], [0], [0], [0, 0, 1, 0], [], []>} : vector<8x8xbf16>, vector<8x8xbf16>, vector<8x8xf32> -> vector<8x8xf32>
    %c0_10 = arith.constant 0 : index
    %c0_11 = arith.constant 0 : index
    %18 = vector.load %arg6[%c0_10, %c0_11] : memref<8x8xf32, #tpu.memory_space<vmem>>, vector<8x8xf32>
    %19 = arith.addf %17, %18 : vector<8x8xf32>
    %cst_12 = arith.constant dense<0xFF800000> : vector<8xf32>
    %20 = vector.multi_reduction <maximumf>, %19, %cst_12 [1] : vector<8x8xf32> to vector<8xf32>
    %21 = vector.shape_cast %20 : vector<8xf32> to vector<8x1xf32>
    %22 = vector.broadcast %21 : vector<8x1xf32> to vector<8x8xf32>
    %23 = arith.subf %19, %22 : vector<8x8xf32>
    %24 = math.exp %23 : vector<8x8xf32>
    %cst_13 = arith.constant dense<0.000000e+00> : vector<8xf32>
    %25 = vector.multi_reduction <add>, %24, %cst_13 [1] : vector<8x8xf32> to vector<8xf32>
    %26 = vector.shape_cast %25 : vector<8xf32> to vector<8x1xf32>
    %27 = vector.broadcast %26 : vector<8x1xf32> to vector<8x8xf32>
    %28 = arith.divf %24, %27 : vector<8x8xf32>
    %29 = arith.truncf %28 : vector<8x8xf32> to vector<8x8xbf16>
    %cst_14 = arith.constant dense<0.000000e+00> : vector<8x8xf32>
    %30 = tpu.matmul %29, %16, %cst_14 {dimension_numbers = #tpu.dot_dimension_numbers<[1], [0], [0], [1], [0, 0, 1, 1], [], []>} : vector<8x8xbf16>, vector<8x8xbf16>, vector<8x8xf32> -> vector<8x8xf32>
    %c0_15 = arith.constant 0 : index
    %c0_16 = arith.constant 0 : index
    %31 = vector.load %arg13[%c0_15, %c0_16] : memref<8x32xf32, #tpu.memory_space<vmem>>, vector<8x32xf32>
    %32 = arith.truncf %30 : vector<8x8xf32> to vector<8x8xbf16>
    %33 = arith.index_cast %arg2 : i32 to index
    %c0_17 = arith.constant 0 : index
    %c0_18 = arith.constant 0 : index
    %34 = vector.load %arg7[%33, %c0_17, %c0_18] : memref<4x8x32xf32, #tpu.memory_space<vmem>>, vector<1x8x32xf32>
    %35 = vector.shape_cast %34 : vector<1x8x32xf32> to vector<8x32xf32>
    %36 = arith.truncf %35 : vector<8x32xf32> to vector<8x32xbf16>
    %cst_19 = arith.constant dense<0.000000e+00> : vector<8x32xf32>
    %37 = tpu.matmul %32, %36, %cst_19 {dimension_numbers = #tpu.dot_dimension_numbers<[1], [0], [0], [1], [0, 0, 1, 1], [], []>} : vector<8x8xbf16>, vector<8x32xbf16>, vector<8x32xf32> -> vector<8x32xf32>
    %38 = arith.addf %31, %37 : vector<8x32xf32>
    %c0_20 = arith.constant 0 : index
    %c0_21 = arith.constant 0 : index
    %39 = vector.load %arg13[%c0_20, %c0_21] : memref<8x32xf32, #tpu.memory_space<vmem>>, vector<8x32xf32>
    tpu.vector_store %arg13[%c0_20, %c0_21], %38 {strides = array<i32>} : memref<8x32xf32, #tpu.memory_space<vmem>>, vector<8x32xf32>,
    %c3_i32 = arith.constant 3 : i32
    %40 = arith.cmpi eq, %arg2, %c3_i32 : i32
    %41 = arith.extui %40 : i1 to i32
    %c0_i32_22 = arith.constant 0 : i32
    %42 = arith.cmpi ne, %41, %c0_i32_22 : i32
    scf.if %42 {
      %c0_23 = arith.constant 0 : index
      %c0_24 = arith.constant 0 : index
      %43 = vector.load %arg13[%c0_23, %c0_24] : memref<8x32xf32, #tpu.memory_space<vmem>>, vector<8x32xf32>
      %c0_25 = arith.constant 0 : index
      %c0_26 = arith.constant 0 : index
      %44 = vector.load %arg8[%c0_25, %c0_26] : memref<1x32xf32, #tpu.memory_space<vmem>>, vector<1x32xf32>
      %45 = vector.broadcast %44 : vector<1x32xf32> to vector<8x32xf32>
      %46 = arith.addf %43, %45 : vector<8x32xf32>
      %c0_27 = arith.constant 0 : index
      %c0_28 = arith.constant 0 : index
      %c0_29 = arith.constant 0 : index
      %47 = vector.load %arg9[%c0_27, %c0_28, %c0_29] : memref<1x8x32xf32, #tpu.memory_space<vmem>>, vector<1x8x32xf32>
      %48 = vector.shape_cast %47 : vector<1x8x32xf32> to vector<8x32xf32>
      %49 = arith.addf %46, %48 : vector<8x32xf32>
      %c0_30 = arith.constant 0 : index
      %c0_31 = arith.constant 0 : index
      %50 = vector.load %arg10[%c0_30, %c0_31] : memref<1x32xf32, #tpu.memory_space<vmem>>, vector<1x32xf32>
      %c0_32 = arith.constant 0 : index
      %c0_33 = arith.constant 0 : index
      %51 = vector.load %arg11[%c0_32, %c0_33] : memref<1x32xf32, #tpu.memory_space<vmem>>, vector<1x32xf32>
      %cst_34 = arith.constant dense<0.000000e+00> : vector<8xf32>
      %52 = vector.multi_reduction <add>, %49, %cst_34 [1] : vector<8x32xf32> to vector<8xf32>
      %53 = vector.shape_cast %52 : vector<8xf32> to vector<8x1xf32>
      %cst_35 = arith.constant 3.200000e+01 : f32
      %54 = vector.broadcast %cst_35 : f32 to vector<8x1xf32>
      %55 = arith.divf %53, %54 : vector<8x1xf32>
      %56 = vector.broadcast %55 : vector<8x1xf32> to vector<8x32xf32>
      %57 = arith.subf %49, %56 : vector<8x32xf32>
      %58 = arith.mulf %57, %57 : vector<8x32xf32>
      %cst_36 = arith.constant dense<0.000000e+00> : vector<8xf32>
      %59 = vector.multi_reduction <add>, %58, %cst_36 [1] : vector<8x32xf32> to vector<8xf32>
      %60 = vector.shape_cast %59 : vector<8xf32> to vector<8x1xf32>
      %cst_37 = arith.constant 3.200000e+01 : f32
      %61 = vector.broadcast %cst_37 : f32 to vector<8x1xf32>
      %62 = arith.divf %60, %61 : vector<8x1xf32>
      %cst_38 = arith.constant 9.99999974E-6 : f32
      %63 = vector.broadcast %cst_38 : f32 to vector<8x1xf32>
      %64 = arith.addf %62, %63 : vector<8x1xf32>
      %65 = math.rsqrt %64 : vector<8x1xf32>
      %66 = vector.broadcast %65 : vector<8x1xf32> to vector<8x32xf32>
      %67 = arith.mulf %57, %66 : vector<8x32xf32>
      %68 = vector.broadcast %50 : vector<1x32xf32> to vector<8x32xf32>
      %69 = arith.mulf %67, %68 : vector<8x32xf32>
      %70 = vector.broadcast %51 : vector<1x32xf32> to vector<8x32xf32>
      %71 = arith.addf %69, %70 : vector<8x32xf32>
      %c0_39 = arith.constant 0 : index
      %c0_40 = arith.constant 0 : index
      %c0_41 = arith.constant 0 : index
      %72 = vector.load %arg12[%c0_39, %c0_40, %c0_41] : memref<1x8x32xf32, #tpu.memory_space<vmem>>, vector<1x8x32xf32>
      %73 = vector.shape_cast %72 : vector<1x8x32xf32> to vector<8x32xf32>
      %74 = vector.shape_cast %71 : vector<8x32xf32> to vector<1x8x32xf32>
      tpu.vector_store %arg12[%c0_39, %c0_40, %c0_41], %74 {strides = array<i32>} : memref<1x8x32xf32, #tpu.memory_space<vmem>>, vector<1x8x32xf32>,
    } else {
    }
    return
  }
  func.func @transform_0(%arg0: i32, %arg1: i32, %arg2: i32) -> (i32, i32, i32, i32) {
    %c0_i32 = arith.constant 0 : i32
    %c0_i32_0 = arith.constant 0 : i32
    %c0_i32_1 = arith.constant 0 : i32
    return %arg0, %c0_i32, %arg1, %c0_i32_0 : i32, i32, i32, i32
  }
  func.func @transform_1(%arg0: i32, %arg1: i32, %arg2: i32) -> (i32, i32, i32, i32) {
    %c0_i32 = arith.constant 0 : i32
    %c0_i32_0 = arith.constant 0 : i32
    %c0_i32_1 = arith.constant 0 : i32
    %c0_i32_2 = arith.constant 0 : i32
    return %arg0, %c0_i32, %c0_i32_0, %c0_i32_1 : i32, i32, i32, i32
  }
  func.func @transform_2(%arg0: i32, %arg1: i32, %arg2: i32) -> (i32, i32, i32, i32) {
    %c0_i32 = arith.constant 0 : i32
    %c0_i32_0 = arith.constant 0 : i32
    %c0_i32_1 = arith.constant 0 : i32
    %c0_i32_2 = arith.constant 0 : i32
    return %arg0, %c0_i32, %c0_i32_0, %c0_i32_1 : i32, i32, i32, i32
  }
  func.func @transform_3(%arg0: i32, %arg1: i32, %arg2: i32) -> (i32, i32) {
    %c0_i32 = arith.constant 0 : i32
    %c0_i32_0 = arith.constant 0 : i32
    return %arg1, %c0_i32 : i32, i32
  }
  func.func @transform_4(%arg0: i32, %arg1: i32, %arg2: i32) -> (i32, i32, i32) {
    %c0_i32 = arith.constant 0 : i32
    %c0_i32_0 = arith.constant 0 : i32
    %c0_i32_1 = arith.constant 0 : i32
    %c0_i32_2 = arith.constant 0 : i32
    return %c0_i32, %c0_i32_0, %c0_i32_1 : i32, i32, i32
  }
  func.func @transform_5(%arg0: i32, %arg1: i32, %arg2: i32) -> (i32, i32) {
    %c0_i32 = arith.constant 0 : i32
    %c0_i32_0 = arith.constant 0 : i32
    %c0_i32_1 = arith.constant 0 : i32
    return %c0_i32, %c0_i32_0 : i32, i32
  }
  func.func @transform_6(%arg0: i32, %arg1: i32, %arg2: i32) -> (i32, i32, i32) {
    %c0_i32 = arith.constant 0 : i32
    %c0_i32_0 = arith.constant 0 : i32
    return %arg0, %arg1, %c0_i32 : i32, i32, i32
  }
  func.func @transform_7(%arg0: i32, %arg1: i32, %arg2: i32) -> (i32, i32) {
    %c0_i32 = arith.constant 0 : i32
    %c0_i32_0 = arith.constant 0 : i32
    %c0_i32_1 = arith.constant 0 : i32
    return %c0_i32, %c0_i32_0 : i32, i32
  }
  func.func @transform_8(%arg0: i32, %arg1: i32, %arg2: i32) -> (i32, i32) {
    %c0_i32 = arith.constant 0 : i32
    %c0_i32_0 = arith.constant 0 : i32
    %c0_i32_1 = arith.constant 0 : i32
    return %c0_i32, %c0_i32_0 : i32, i32
  }
  func.func @transform_9(%arg0: i32, %arg1: i32, %arg2: i32) -> (i32, i32, i32) {
    %c0_i32 = arith.constant 0 : i32
    %c0_i32_0 = arith.constant 0 : i32
    return %arg0, %arg1, %c0_i32 : i32, i32, i32
  }
}

module attributes {stable_mosaic.version = 11 : i64} {
  func.func @_matmul_bias_kernel(%arg0: i32, %arg1: i32, %arg2: i32, %arg3: memref<16x32xf32, #tpu.memory_space<vmem>>, %arg4: memref<32x64xf32, #tpu.memory_space<vmem>>, %arg5: memref<1x64xf32, #tpu.memory_space<vmem>>, %arg6: memref<16x64xf32, #tpu.memory_space<vmem>>, %arg7: memref<16x64xf32, #tpu.memory_space<vmem>>) attributes {dimension_semantics = [#tpu.dimension_semantics<parallel>, #tpu.dimension_semantics<parallel>, #tpu.dimension_semantics<arbitrary>], iteration_bounds = array<i64: 1, 1, 1>, scalar_prefetch = 0 : i64, scratch_operands = 1 : i64, tpu.core_type = #tpu.core_type<tc>, window_params = [{transform_indices = @transform_0, window_bounds = array<i64: 16, 32>}, {transform_indices = @transform_1, window_bounds = array<i64: 32, 64>}, {transform_indices = @transform_2, window_bounds = array<i64: 1, 64>}, {transform_indices = @transform_3, window_bounds = array<i64: 16, 64>}]} {
    %c0_i32 = arith.constant 0 : i32
    %0 = arith.cmpi eq, %arg2, %c0_i32 : i32
    %1 = arith.extui %0 : i1 to i32
    %c0_i32_0 = arith.constant 0 : i32
    %2 = arith.cmpi ne, %1, %c0_i32_0 : i32
    scf.if %2 {
      %cst_10 = arith.constant 0.000000e+00 : f32
      %14 = vector.broadcast %cst_10 : f32 to vector<16x64xf32>
      %c0_11 = arith.constant 0 : index
      %c0_12 = arith.constant 0 : index
      %15 = vector.load %arg7[%c0_11, %c0_12] : memref<16x64xf32, #tpu.memory_space<vmem>>, vector<16x64xf32>
      tpu.vector_store %arg7[%c0_11, %c0_12], %14 {strides = array<i32>} : memref<16x64xf32, #tpu.memory_space<vmem>>, vector<16x64xf32>,
    } else {
    }
    %c0 = arith.constant 0 : index
    %c0_1 = arith.constant 0 : index
    %3 = vector.load %arg7[%c0, %c0_1] : memref<16x64xf32, #tpu.memory_space<vmem>>, vector<16x64xf32>
    %c0_2 = arith.constant 0 : index
    %c0_3 = arith.constant 0 : index
    %4 = vector.load %arg3[%c0_2, %c0_3] : memref<16x32xf32, #tpu.memory_space<vmem>>, vector<16x32xf32>
    %5 = arith.truncf %4 : vector<16x32xf32> to vector<16x32xbf16>
    %c0_4 = arith.constant 0 : index
    %c0_5 = arith.constant 0 : index
    %6 = vector.load %arg4[%c0_4, %c0_5] : memref<32x64xf32, #tpu.memory_space<vmem>>, vector<32x64xf32>
    %7 = arith.truncf %6 : vector<32x64xf32> to vector<32x64xbf16>
    %cst = arith.constant dense<0.000000e+00> : vector<16x64xf32>
    %8 = tpu.matmul %5, %7, %cst {dimension_numbers = #tpu.dot_dimension_numbers<[1], [0], [0], [1], [0, 0, 1, 1], [], []>} : vector<16x32xbf16>, vector<32x64xbf16>, vector<16x64xf32> -> vector<16x64xf32>
    %9 = arith.addf %3, %8 : vector<16x64xf32>
    %c0_6 = arith.constant 0 : index
    %c0_7 = arith.constant 0 : index
    %10 = vector.load %arg7[%c0_6, %c0_7] : memref<16x64xf32, #tpu.memory_space<vmem>>, vector<16x64xf32>
    tpu.vector_store %arg7[%c0_6, %c0_7], %9 {strides = array<i32>} : memref<16x64xf32, #tpu.memory_space<vmem>>, vector<16x64xf32>,
    %c0_i32_8 = arith.constant 0 : i32
    %11 = arith.cmpi eq, %arg2, %c0_i32_8 : i32
    %12 = arith.extui %11 : i1 to i32
    %c0_i32_9 = arith.constant 0 : i32
    %13 = arith.cmpi ne, %12, %c0_i32_9 : i32
    scf.if %13 {
      %c0_10 = arith.constant 0 : index
      %c0_11 = arith.constant 0 : index
      %14 = vector.load %arg7[%c0_10, %c0_11] : memref<16x64xf32, #tpu.memory_space<vmem>>, vector<16x64xf32>
      %c0_12 = arith.constant 0 : index
      %c0_13 = arith.constant 0 : index
      %15 = vector.load %arg5[%c0_12, %c0_13] : memref<1x64xf32, #tpu.memory_space<vmem>>, vector<1x64xf32>
      %16 = vector.broadcast %15 : vector<1x64xf32> to vector<16x64xf32>
      %17 = arith.addf %14, %16 : vector<16x64xf32>
      %c0_14 = arith.constant 0 : index
      %c0_15 = arith.constant 0 : index
      %18 = vector.load %arg6[%c0_14, %c0_15] : memref<16x64xf32, #tpu.memory_space<vmem>>, vector<16x64xf32>
      tpu.vector_store %arg6[%c0_14, %c0_15], %17 {strides = array<i32>} : memref<16x64xf32, #tpu.memory_space<vmem>>, vector<16x64xf32>,
    } else {
    }
    return
  }
  func.func @transform_0(%arg0: i32, %arg1: i32, %arg2: i32) -> (i32, i32) {
    %c0_i32 = arith.constant 0 : i32
    return %arg0, %arg2 : i32, i32
  }
  func.func @transform_1(%arg0: i32, %arg1: i32, %arg2: i32) -> (i32, i32) {
    %c0_i32 = arith.constant 0 : i32
    return %arg2, %arg1 : i32, i32
  }
  func.func @transform_2(%arg0: i32, %arg1: i32, %arg2: i32) -> (i32, i32) {
    %c0_i32 = arith.constant 0 : i32
    %c0_i32_0 = arith.constant 0 : i32
    return %c0_i32, %arg1 : i32, i32
  }
  func.func @transform_3(%arg0: i32, %arg1: i32, %arg2: i32) -> (i32, i32) {
    %c0_i32 = arith.constant 0 : i32
    return %arg0, %arg1 : i32, i32
  }
}

module attributes {stable_mosaic.version = 11 : i64} {
  func.func @_matmul_bias_kernel(%arg0: i32, %arg1: i32, %arg2: i32, %arg3: memref<16x32xf32, #tpu.memory_space<vmem>>, %arg4: memref<32x96xf32, #tpu.memory_space<vmem>>, %arg5: memref<1x96xf32, #tpu.memory_space<vmem>>, %arg6: memref<16x96xf32, #tpu.memory_space<vmem>>, %arg7: memref<16x96xf32, #tpu.memory_space<vmem>>) attributes {dimension_semantics = [#tpu.dimension_semantics<parallel>, #tpu.dimension_semantics<parallel>, #tpu.dimension_semantics<arbitrary>], iteration_bounds = array<i64: 1, 1, 1>, scalar_prefetch = 0 : i64, scratch_operands = 1 : i64, tpu.core_type = #tpu.core_type<tc>, window_params = [{transform_indices = @transform_0, window_bounds = array<i64: 16, 32>}, {transform_indices = @transform_1, window_bounds = array<i64: 32, 96>}, {transform_indices = @transform_2, window_bounds = array<i64: 1, 96>}, {transform_indices = @transform_3, window_bounds = array<i64: 16, 96>}]} {
    %c0_i32 = arith.constant 0 : i32
    %0 = arith.cmpi eq, %arg2, %c0_i32 : i32
    %1 = arith.extui %0 : i1 to i32
    %c0_i32_0 = arith.constant 0 : i32
    %2 = arith.cmpi ne, %1, %c0_i32_0 : i32
    scf.if %2 {
      %cst_10 = arith.constant 0.000000e+00 : f32
      %14 = vector.broadcast %cst_10 : f32 to vector<16x96xf32>
      %c0_11 = arith.constant 0 : index
      %c0_12 = arith.constant 0 : index
      %15 = vector.load %arg7[%c0_11, %c0_12] : memref<16x96xf32, #tpu.memory_space<vmem>>, vector<16x96xf32>
      tpu.vector_store %arg7[%c0_11, %c0_12], %14 {strides = array<i32>} : memref<16x96xf32, #tpu.memory_space<vmem>>, vector<16x96xf32>,
    } else {
    }
    %c0 = arith.constant 0 : index
    %c0_1 = arith.constant 0 : index
    %3 = vector.load %arg7[%c0, %c0_1] : memref<16x96xf32, #tpu.memory_space<vmem>>, vector<16x96xf32>
    %c0_2 = arith.constant 0 : index
    %c0_3 = arith.constant 0 : index
    %4 = vector.load %arg3[%c0_2, %c0_3] : memref<16x32xf32, #tpu.memory_space<vmem>>, vector<16x32xf32>
    %5 = arith.truncf %4 : vector<16x32xf32> to vector<16x32xbf16>
    %c0_4 = arith.constant 0 : index
    %c0_5 = arith.constant 0 : index
    %6 = vector.load %arg4[%c0_4, %c0_5] : memref<32x96xf32, #tpu.memory_space<vmem>>, vector<32x96xf32>
    %7 = arith.truncf %6 : vector<32x96xf32> to vector<32x96xbf16>
    %cst = arith.constant dense<0.000000e+00> : vector<16x96xf32>
    %8 = tpu.matmul %5, %7, %cst {dimension_numbers = #tpu.dot_dimension_numbers<[1], [0], [0], [1], [0, 0, 1, 1], [], []>} : vector<16x32xbf16>, vector<32x96xbf16>, vector<16x96xf32> -> vector<16x96xf32>
    %9 = arith.addf %3, %8 : vector<16x96xf32>
    %c0_6 = arith.constant 0 : index
    %c0_7 = arith.constant 0 : index
    %10 = vector.load %arg7[%c0_6, %c0_7] : memref<16x96xf32, #tpu.memory_space<vmem>>, vector<16x96xf32>
    tpu.vector_store %arg7[%c0_6, %c0_7], %9 {strides = array<i32>} : memref<16x96xf32, #tpu.memory_space<vmem>>, vector<16x96xf32>,
    %c0_i32_8 = arith.constant 0 : i32
    %11 = arith.cmpi eq, %arg2, %c0_i32_8 : i32
    %12 = arith.extui %11 : i1 to i32
    %c0_i32_9 = arith.constant 0 : i32
    %13 = arith.cmpi ne, %12, %c0_i32_9 : i32
    scf.if %13 {
      %c0_10 = arith.constant 0 : index
      %c0_11 = arith.constant 0 : index
      %14 = vector.load %arg7[%c0_10, %c0_11] : memref<16x96xf32, #tpu.memory_space<vmem>>, vector<16x96xf32>
      %c0_12 = arith.constant 0 : index
      %c0_13 = arith.constant 0 : index
      %15 = vector.load %arg5[%c0_12, %c0_13] : memref<1x96xf32, #tpu.memory_space<vmem>>, vector<1x96xf32>
      %16 = vector.broadcast %15 : vector<1x96xf32> to vector<16x96xf32>
      %17 = arith.addf %14, %16 : vector<16x96xf32>
      %c0_14 = arith.constant 0 : index
      %c0_15 = arith.constant 0 : index
      %18 = vector.load %arg6[%c0_14, %c0_15] : memref<16x96xf32, #tpu.memory_space<vmem>>, vector<16x96xf32>
      tpu.vector_store %arg6[%c0_14, %c0_15], %17 {strides = array<i32>} : memref<16x96xf32, #tpu.memory_space<vmem>>, vector<16x96xf32>,
    } else {
    }
    return
  }
  func.func @transform_0(%arg0: i32, %arg1: i32, %arg2: i32) -> (i32, i32) {
    %c0_i32 = arith.constant 0 : i32
    return %arg0, %arg2 : i32, i32
  }
  func.func @transform_1(%arg0: i32, %arg1: i32, %arg2: i32) -> (i32, i32) {
    %c0_i32 = arith.constant 0 : i32
    return %arg2, %arg1 : i32, i32
  }
  func.func @transform_2(%arg0: i32, %arg1: i32, %arg2: i32) -> (i32, i32) {
    %c0_i32 = arith.constant 0 : i32
    %c0_i32_0 = arith.constant 0 : i32
    return %c0_i32, %arg1 : i32, i32
  }
  func.func @transform_3(%arg0: i32, %arg1: i32, %arg2: i32) -> (i32, i32) {
    %c0_i32 = arith.constant 0 : i32
    return %arg0, %arg1 : i32, i32
  }
}

module attributes {stable_mosaic.version = 11 : i64} {
  func.func @_ffn_kernel(%arg0: i32, %arg1: i32, %arg2: memref<16x32xf32, #tpu.memory_space<vmem>>, %arg3: memref<32x64xf32, #tpu.memory_space<vmem>>, %arg4: memref<1x64xf32, #tpu.memory_space<vmem>>, %arg5: memref<64x32xf32, #tpu.memory_space<vmem>>, %arg6: memref<1x32xf32, #tpu.memory_space<vmem>>, %arg7: memref<1x32xf32, #tpu.memory_space<vmem>>, %arg8: memref<1x32xf32, #tpu.memory_space<vmem>>, %arg9: memref<16x32xf32, #tpu.memory_space<vmem>>, %arg10: memref<16x32xf32, #tpu.memory_space<vmem>>) attributes {dimension_semantics = [#tpu.dimension_semantics<parallel>, #tpu.dimension_semantics<arbitrary>], iteration_bounds = array<i64: 1, 1>, scalar_prefetch = 0 : i64, scratch_operands = 1 : i64, tpu.core_type = #tpu.core_type<tc>, window_params = [{transform_indices = @transform_0, window_bounds = array<i64: 16, 32>}, {transform_indices = @transform_1, window_bounds = array<i64: 32, 64>}, {transform_indices = @transform_2, window_bounds = array<i64: 1, 64>}, {transform_indices = @transform_3, window_bounds = array<i64: 64, 32>}, {pipeline_mode = #tpu.pipeline_mode<synchronous>, transform_indices = @transform_4, window_bounds = array<i64: 1, 32>}, {pipeline_mode = #tpu.pipeline_mode<synchronous>, transform_indices = @transform_5, window_bounds = array<i64: 1, 32>}, {pipeline_mode = #tpu.pipeline_mode<synchronous>, transform_indices = @transform_6, window_bounds = array<i64: 1, 32>}, {transform_indices = @transform_7, window_bounds = array<i64: 16, 32>}]} {
    %c0_i32 = arith.constant 0 : i32
    %0 = arith.cmpi eq, %arg1, %c0_i32 : i32
    %1 = arith.extui %0 : i1 to i32
    %c0_i32_0 = arith.constant 0 : i32
    %2 = arith.cmpi ne, %1, %c0_i32_0 : i32
    scf.if %2 {
      %cst_16 = arith.constant 0.000000e+00 : f32
      %23 = vector.broadcast %cst_16 : f32 to vector<16x32xf32>
      %c0_17 = arith.constant 0 : index
      %c0_18 = arith.constant 0 : index
      %24 = vector.load %arg10[%c0_17, %c0_18] : memref<16x32xf32, #tpu.memory_space<vmem>>, vector<16x32xf32>
      tpu.vector_store %arg10[%c0_17, %c0_18], %23 {strides = array<i32>} : memref<16x32xf32, #tpu.memory_space<vmem>>, vector<16x32xf32>,
    } else {
    }
    %c0 = arith.constant 0 : index
    %c0_1 = arith.constant 0 : index
    %3 = vector.load %arg2[%c0, %c0_1] : memref<16x32xf32, #tpu.memory_space<vmem>>, vector<16x32xf32>
    %4 = arith.truncf %3 : vector<16x32xf32> to vector<16x32xbf16>
    %c0_2 = arith.constant 0 : index
    %c0_3 = arith.constant 0 : index
    %5 = vector.load %arg3[%c0_2, %c0_3] : memref<32x64xf32, #tpu.memory_space<vmem>>, vector<32x64xf32>
    %6 = arith.truncf %5 : vector<32x64xf32> to vector<32x64xbf16>
    %cst = arith.constant dense<0.000000e+00> : vector<16x64xf32>
    %7 = tpu.matmul %4, %6, %cst {dimension_numbers = #tpu.dot_dimension_numbers<[1], [0], [0], [1], [0, 0, 1, 1], [], []>} : vector<16x32xbf16>, vector<32x64xbf16>, vector<16x64xf32> -> vector<16x64xf32>
    %c0_4 = arith.constant 0 : index
    %c0_5 = arith.constant 0 : index
    %8 = vector.load %arg4[%c0_4, %c0_5] : memref<1x64xf32, #tpu.memory_space<vmem>>, vector<1x64xf32>
    %9 = vector.broadcast %8 : vector<1x64xf32> to vector<16x64xf32>
    %10 = arith.addf %7, %9 : vector<16x64xf32>
    %cst_6 = arith.constant 0.000000e+00 : f32
    %11 = vector.broadcast %cst_6 : f32 to vector<16x64xf32>
    %12 = arith.maximumf %10, %11 : vector<16x64xf32>
    %c0_7 = arith.constant 0 : index
    %c0_8 = arith.constant 0 : index
    %13 = vector.load %arg10[%c0_7, %c0_8] : memref<16x32xf32, #tpu.memory_space<vmem>>, vector<16x32xf32>
    %14 = arith.truncf %12 : vector<16x64xf32> to vector<16x64xbf16>
    %c0_9 = arith.constant 0 : index
    %c0_10 = arith.constant 0 : index
    %15 = vector.load %arg5[%c0_9, %c0_10] : memref<64x32xf32, #tpu.memory_space<vmem>>, vector<64x32xf32>
    %16 = arith.truncf %15 : vector<64x32xf32> to vector<64x32xbf16>
    %cst_11 = arith.constant dense<0.000000e+00> : vector<16x32xf32>
    %17 = tpu.matmul %14, %16, %cst_11 {dimension_numbers = #tpu.dot_dimension_numbers<[1], [0], [0], [1], [0, 0, 1, 1], [], []>} : vector<16x64xbf16>, vector<64x32xbf16>, vector<16x32xf32> -> vector<16x32xf32>
    %18 = arith.addf %13, %17 : vector<16x32xf32>
    %c0_12 = arith.constant 0 : index
    %c0_13 = arith.constant 0 : index
    %19 = vector.load %arg10[%c0_12, %c0_13] : memref<16x32xf32, #tpu.memory_space<vmem>>, vector<16x32xf32>
    tpu.vector_store %arg10[%c0_12, %c0_13], %18 {strides = array<i32>} : memref<16x32xf32, #tpu.memory_space<vmem>>, vector<16x32xf32>,
    %c0_i32_14 = arith.constant 0 : i32
    %20 = arith.cmpi eq, %arg1, %c0_i32_14 : i32
    %21 = arith.extui %20 : i1 to i32
    %c0_i32_15 = arith.constant 0 : i32
    %22 = arith.cmpi ne, %21, %c0_i32_15 : i32
    scf.if %22 {
      %c0_16 = arith.constant 0 : index
      %c0_17 = arith.constant 0 : index
      %23 = vector.load %arg10[%c0_16, %c0_17] : memref<16x32xf32, #tpu.memory_space<vmem>>, vector<16x32xf32>
      %c0_18 = arith.constant 0 : index
      %c0_19 = arith.constant 0 : index
      %24 = vector.load %arg6[%c0_18, %c0_19] : memref<1x32xf32, #tpu.memory_space<vmem>>, vector<1x32xf32>
      %25 = vector.broadcast %24 : vector<1x32xf32> to vector<16x32xf32>
      %26 = arith.addf %23, %25 : vector<16x32xf32>
      %27 = arith.addf %26, %3 : vector<16x32xf32>
      %c0_20 = arith.constant 0 : index
      %c0_21 = arith.constant 0 : index
      %28 = vector.load %arg7[%c0_20, %c0_21] : memref<1x32xf32, #tpu.memory_space<vmem>>, vector<1x32xf32>
      %c0_22 = arith.constant 0 : index
      %c0_23 = arith.constant 0 : index
      %29 = vector.load %arg8[%c0_22, %c0_23] : memref<1x32xf32, #tpu.memory_space<vmem>>, vector<1x32xf32>
      %cst_24 = arith.constant dense<0.000000e+00> : vector<16xf32>
      %30 = vector.multi_reduction <add>, %27, %cst_24 [1] : vector<16x32xf32> to vector<16xf32>
      %31 = vector.shape_cast %30 : vector<16xf32> to vector<16x1xf32>
      %cst_25 = arith.constant 3.200000e+01 : f32
      %32 = vector.broadcast %cst_25 : f32 to vector<16x1xf32>
      %33 = arith.divf %31, %32 : vector<16x1xf32>
      %34 = vector.broadcast %33 : vector<16x1xf32> to vector<16x32xf32>
      %35 = arith.subf %27, %34 : vector<16x32xf32>
      %36 = arith.mulf %35, %35 : vector<16x32xf32>
      %cst_26 = arith.constant dense<0.000000e+00> : vector<16xf32>
      %37 = vector.multi_reduction <add>, %36, %cst_26 [1] : vector<16x32xf32> to vector<16xf32>
      %38 = vector.shape_cast %37 : vector<16xf32> to vector<16x1xf32>
      %cst_27 = arith.constant 3.200000e+01 : f32
      %39 = vector.broadcast %cst_27 : f32 to vector<16x1xf32>
      %40 = arith.divf %38, %39 : vector<16x1xf32>
      %cst_28 = arith.constant 9.99999974E-6 : f32
      %41 = vector.broadcast %cst_28 : f32 to vector<16x1xf32>
      %42 = arith.addf %40, %41 : vector<16x1xf32>
      %43 = math.rsqrt %42 : vector<16x1xf32>
      %44 = vector.broadcast %43 : vector<16x1xf32> to vector<16x32xf32>
      %45 = arith.mulf %35, %44 : vector<16x32xf32>
      %46 = vector.broadcast %28 : vector<1x32xf32> to vector<16x32xf32>
      %47 = arith.mulf %45, %46 : vector<16x32xf32>
      %48 = vector.broadcast %29 : vector<1x32xf32> to vector<16x32xf32>
      %49 = arith.addf %47, %48 : vector<16x32xf32>
      %c0_29 = arith.constant 0 : index
      %c0_30 = arith.constant 0 : index
      %50 = vector.load %arg9[%c0_29, %c0_30] : memref<16x32xf32, #tpu.memory_space<vmem>>, vector<16x32xf32>
      tpu.vector_store %arg9[%c0_29, %c0_30], %49 {strides = array<i32>} : memref<16x32xf32, #tpu.memory_space<vmem>>, vector<16x32xf32>,
    } else {
    }
    return
  }
  func.func @transform_0(%arg0: i32, %arg1: i32) -> (i32, i32) {
    %c0_i32 = arith.constant 0 : i32
    %c0_i32_0 = arith.constant 0 : i32
    return %arg0, %c0_i32 : i32, i32
  }
  func.func @transform_1(%arg0: i32, %arg1: i32) -> (i32, i32) {
    %c0_i32 = arith.constant 0 : i32
    %c0_i32_0 = arith.constant 0 : i32
    return %c0_i32, %arg1 : i32, i32
  }
  func.func @transform_2(%arg0: i32, %arg1: i32) -> (i32, i32) {
    %c0_i32 = arith.constant 0 : i32
    %c0_i32_0 = arith.constant 0 : i32
    return %c0_i32, %arg1 : i32, i32
  }
  func.func @transform_3(%arg0: i32, %arg1: i32) -> (i32, i32) {
    %c0_i32 = arith.constant 0 : i32
    %c0_i32_0 = arith.constant 0 : i32
    return %arg1, %c0_i32 : i32, i32
  }
  func.func @transform_4(%arg0: i32, %arg1: i32) -> (i32, i32) {
    %c0_i32 = arith.constant 0 : i32
    %c0_i32_0 = arith.constant 0 : i32
    %c0_i32_1 = arith.constant 0 : i32
    return %c0_i32, %c0_i32_0 : i32, i32
  }
  func.func @transform_5(%arg0: i32, %arg1: i32) -> (i32, i32) {
    %c0_i32 = arith.constant 0 : i32
    %c0_i32_0 = arith.constant 0 : i32
    %c0_i32_1 = arith.constant 0 : i32
    return %c0_i32, %c0_i32_0 : i32, i32
  }
  func.func @transform_6(%arg0: i32, %arg1: i32) -> (i32, i32) {
    %c0_i32 = arith.constant 0 : i32
    %c0_i32_0 = arith.constant 0 : i32
    %c0_i32_1 = arith.constant 0 : i32
    return %c0_i32, %c0_i32_0 : i32, i32
  }
  func.func @transform_7(%arg0: i32, %arg1: i32) -> (i32, i32) {
    %c0_i32 = arith.constant 0 : i32
    %c0_i32_0 = arith.constant 0 : i32
    return %arg0, %c0_i32 : i32, i32
  }
}

module attributes {stable_mosaic.version = 11 : i64} {
  func.func @_attention_kernel(%arg0: i32, %arg1: i32, %arg2: i32, %arg3: memref<1x4x8x8xf32, #tpu.memory_space<vmem>>, %arg4: memref<1x4x8x8xf32, #tpu.memory_space<vmem>>, %arg5: memref<1x4x8x8xf32, #tpu.memory_space<vmem>>, %arg6: memref<4x8x32xf32, #tpu.memory_space<vmem>>, %arg7: memref<1x32xf32, #tpu.memory_space<vmem>>, %arg8: memref<1x8x32xf32, #tpu.memory_space<vmem>>, %arg9: memref<1x32xf32, #tpu.memory_space<vmem>>, %arg10: memref<1x32xf32, #tpu.memory_space<vmem>>, %arg11: memref<1x8x32xf32, #tpu.memory_space<vmem>>, %arg12: memref<8x32xf32, #tpu.memory_space<vmem>>) attributes {dimension_semantics = [#tpu.dimension_semantics<parallel>, #tpu.dimension_semantics<parallel>, #tpu.dimension_semantics<arbitrary>], iteration_bounds = array<i64: 2, 1, 4>, scalar_prefetch = 0 : i64, scratch_operands = 1 : i64, tpu.core_type = #tpu.core_type<tc>, window_params = [{transform_indices = @transform_0, window_bounds = array<i64: 1, 4, 8, 8>}, {transform_indices = @transform_1, window_bounds = array<i64: 1, 4, 8, 8>}, {transform_indices = @transform_2, window_bounds = array<i64: 1, 4, 8, 8>}, {pipeline_mode = #tpu.pipeline_mode<synchronous>, transform_indices = @transform_3, window_bounds = array<i64: 4, 8, 32>}, {pipeline_mode = #tpu.pipeline_mode<synchronous>, transform_indices = @transform_4, window_bounds = array<i64: 1, 32>}, {transform_indices = @transform_5, window_bounds = array<i64: 1, 8, 32>}, {pipeline_mode = #tpu.pipeline_mode<synchronous>, transform_indices = @transform_6, window_bounds = array<i64: 1, 32>}, {pipeline_mode = #tpu.pipeline_mode<synchronous>, transform_indices = @transform_7, window_bounds = array<i64: 1, 32>}, {transform_indices = @transform_8, window_bounds = array<i64: 1, 8, 32>}]} {
    %c0_i32 = arith.constant 0 : i32
    %0 = arith.cmpi eq, %arg2, %c0_i32 : i32
    %1 = arith.extui %0 : i1 to i32
    %c0_i32_0 = arith.constant 0 : i32
    %2 = arith.cmpi ne, %1, %c0_i32_0 : i32
    scf.if %2 {
      %cst_21 = arith.constant 0.000000e+00 : f32
      %41 = vector.broadcast %cst_21 : f32 to vector<8x32xf32>
      %c0_22 = arith.constant 0 : index
      %c0_23 = arith.constant 0 : index
      %42 = vector.load %arg12[%c0_22, %c0_23] : memref<8x32xf32, #tpu.memory_space<vmem>>, vector<8x32xf32>
      tpu.vector_store %arg12[%c0_22, %c0_23], %41 {strides = array<i32>} : memref<8x32xf32, #tpu.memory_space<vmem>>, vector<8x32xf32>,
    } else {
    }
    %c0 = arith.constant 0 : index
    %3 = arith.index_cast %arg2 : i32 to index
    %c0_1 = arith.constant 0 : index
    %c0_2 = arith.constant 0 : index
    %4 = vector.load %arg3[%c0, %3, %c0_1, %c0_2] : memref<1x4x8x8xf32, #tpu.memory_space<vmem>>, vector<1x1x8x8xf32>
    %5 = vector.shape_cast %4 : vector<1x1x8x8xf32> to vector<8x8xf32>
    %cst = arith.constant 0.353553385 : f32
    %6 = vector.broadcast %cst : f32 to vector<8x8xf32>
    %7 = arith.mulf %5, %6 : vector<8x8xf32>
    %8 = arith.truncf %7 : vector<8x8xf32> to vector<8x8xbf16>
    %c0_3 = arith.constant 0 : index
    %9 = arith.index_cast %arg2 : i32 to index
    %c0_4 = arith.constant 0 : index
    %c0_5 = arith.constant 0 : index
    %10 = vector.load %arg4[%c0_3, %9, %c0_4, %c0_5] : memref<1x4x8x8xf32, #tpu.memory_space<vmem>>, vector<1x1x8x8xf32>
    %11 = vector.shape_cast %10 : vector<1x1x8x8xf32> to vector<8x8xf32>
    %12 = arith.truncf %11 : vector<8x8xf32> to vector<8x8xbf16>
    %c0_6 = arith.constant 0 : index
    %13 = arith.index_cast %arg2 : i32 to index
    %c0_7 = arith.constant 0 : index
    %c0_8 = arith.constant 0 : index
    %14 = vector.load %arg5[%c0_6, %13, %c0_7, %c0_8] : memref<1x4x8x8xf32, #tpu.memory_space<vmem>>, vector<1x1x8x8xf32>
    %15 = vector.shape_cast %14 : vector<1x1x8x8xf32> to vector<8x8xf32>
    %16 = arith.truncf %15 : vector<8x8xf32> to vector<8x8xbf16>
    %cst_9 = arith.constant dense<0.000000e+00> : vector<8x8xf32>
    %17 = tpu.matmul %8, %12, %cst_9 {dimension_numbers = #tpu.dot_dimension_numbers<[1], [1], [0], [0], [0, 0, 1, 0], [], []>} : vector<8x8xbf16>, vector<8x8xbf16>, vector<8x8xf32> -> vector<8x8xf32>
    %cst_10 = arith.constant dense<0xFF800000> : vector<8xf32>
    %18 = vector.multi_reduction <maximumf>, %17, %cst_10 [1] : vector<8x8xf32> to vector<8xf32>
    %19 = vector.shape_cast %18 : vector<8xf32> to vector<8x1xf32>
    %20 = vector.broadcast %19 : vector<8x1xf32> to vector<8x8xf32>
    %21 = arith.subf %17, %20 : vector<8x8xf32>
    %22 = math.exp %21 : vector<8x8xf32>
    %cst_11 = arith.constant dense<0.000000e+00> : vector<8xf32>
    %23 = vector.multi_reduction <add>, %22, %cst_11 [1] : vector<8x8xf32> to vector<8xf32>
    %24 = vector.shape_cast %23 : vector<8xf32> to vector<8x1xf32>
    %25 = vector.broadcast %24 : vector<8x1xf32> to vector<8x8xf32>
    %26 = arith.divf %22, %25 : vector<8x8xf32>
    %27 = arith.truncf %26 : vector<8x8xf32> to vector<8x8xbf16>
    %cst_12 = arith.constant dense<0.000000e+00> : vector<8x8xf32>
    %28 = tpu.matmul %27, %16, %cst_12 {dimension_numbers = #tpu.dot_dimension_numbers<[1], [0], [0], [1], [0, 0, 1, 1], [], []>} : vector<8x8xbf16>, vector<8x8xbf16>, vector<8x8xf32> -> vector<8x8xf32>
    %c0_13 = arith.constant 0 : index
    %c0_14 = arith.constant 0 : index
    %29 = vector.load %arg12[%c0_13, %c0_14] : memref<8x32xf32, #tpu.memory_space<vmem>>, vector<8x32xf32>
    %30 = arith.truncf %28 : vector<8x8xf32> to vector<8x8xbf16>
    %31 = arith.index_cast %arg2 : i32 to index
    %c0_15 = arith.constant 0 : index
    %c0_16 = arith.constant 0 : index
    %32 = vector.load %arg6[%31, %c0_15, %c0_16] : memref<4x8x32xf32, #tpu.memory_space<vmem>>, vector<1x8x32xf32>
    %33 = vector.shape_cast %32 : vector<1x8x32xf32> to vector<8x32xf32>
    %34 = arith.truncf %33 : vector<8x32xf32> to vector<8x32xbf16>
    %cst_17 = arith.constant dense<0.000000e+00> : vector<8x32xf32>
    %35 = tpu.matmul %30, %34, %cst_17 {dimension_numbers = #tpu.dot_dimension_numbers<[1], [0], [0], [1], [0, 0, 1, 1], [], []>} : vector<8x8xbf16>, vector<8x32xbf16>, vector<8x32xf32> -> vector<8x32xf32>
    %36 = arith.addf %29, %35 : vector<8x32xf32>
    %c0_18 = arith.constant 0 : index
    %c0_19 = arith.constant 0 : index
    %37 = vector.load %arg12[%c0_18, %c0_19] : memref<8x32xf32, #tpu.memory_space<vmem>>, vector<8x32xf32>
    tpu.vector_store %arg12[%c0_18, %c0_19], %36 {strides = array<i32>} : memref<8x32xf32, #tpu.memory_space<vmem>>, vector<8x32xf32>,
    %c3_i32 = arith.constant 3 : i32
    %38 = arith.cmpi eq, %arg2, %c3_i32 : i32
    %39 = arith.extui %38 : i1 to i32
    %c0_i32_20 = arith.constant 0 : i32
    %40 = arith.cmpi ne, %39, %c0_i32_20 : i32
    scf.if %40 {
      %c0_21 = arith.constant 0 : index
      %c0_22 = arith.constant 0 : index
      %41 = vector.load %arg12[%c0_21, %c0_22] : memref<8x32xf32, #tpu.memory_space<vmem>>, vector<8x32xf32>
      %c0_23 = arith.constant 0 : index
      %c0_24 = arith.constant 0 : index
      %42 = vector.load %arg7[%c0_23, %c0_24] : memref<1x32xf32, #tpu.memory_space<vmem>>, vector<1x32xf32>
      %43 = vector.broadcast %42 : vector<1x32xf32> to vector<8x32xf32>
      %44 = arith.addf %41, %43 : vector<8x32xf32>
      %c0_25 = arith.constant 0 : index
      %c0_26 = arith.constant 0 : index
      %c0_27 = arith.constant 0 : index
      %45 = vector.load %arg8[%c0_25, %c0_26, %c0_27] : memref<1x8x32xf32, #tpu.memory_space<vmem>>, vector<1x8x32xf32>
      %46 = vector.shape_cast %45 : vector<1x8x32xf32> to vector<8x32xf32>
      %47 = arith.addf %44, %46 : vector<8x32xf32>
      %c0_28 = arith.constant 0 : index
      %c0_29 = arith.constant 0 : index
      %48 = vector.load %arg9[%c0_28, %c0_29] : memref<1x32xf32, #tpu.memory_space<vmem>>, vector<1x32xf32>
      %c0_30 = arith.constant 0 : index
      %c0_31 = arith.constant 0 : index
      %49 = vector.load %arg10[%c0_30, %c0_31] : memref<1x32xf32, #tpu.memory_space<vmem>>, vector<1x32xf32>
      %cst_32 = arith.constant dense<0.000000e+00> : vector<8xf32>
      %50 = vector.multi_reduction <add>, %47, %cst_32 [1] : vector<8x32xf32> to vector<8xf32>
      %51 = vector.shape_cast %50 : vector<8xf32> to vector<8x1xf32>
      %cst_33 = arith.constant 3.200000e+01 : f32
      %52 = vector.broadcast %cst_33 : f32 to vector<8x1xf32>
      %53 = arith.divf %51, %52 : vector<8x1xf32>
      %54 = vector.broadcast %53 : vector<8x1xf32> to vector<8x32xf32>
      %55 = arith.subf %47, %54 : vector<8x32xf32>
      %56 = arith.mulf %55, %55 : vector<8x32xf32>
      %cst_34 = arith.constant dense<0.000000e+00> : vector<8xf32>
      %57 = vector.multi_reduction <add>, %56, %cst_34 [1] : vector<8x32xf32> to vector<8xf32>
      %58 = vector.shape_cast %57 : vector<8xf32> to vector<8x1xf32>
      %cst_35 = arith.constant 3.200000e+01 : f32
      %59 = vector.broadcast %cst_35 : f32 to vector<8x1xf32>
      %60 = arith.divf %58, %59 : vector<8x1xf32>
      %cst_36 = arith.constant 9.99999974E-6 : f32
      %61 = vector.broadcast %cst_36 : f32 to vector<8x1xf32>
      %62 = arith.addf %60, %61 : vector<8x1xf32>
      %63 = math.rsqrt %62 : vector<8x1xf32>
      %64 = vector.broadcast %63 : vector<8x1xf32> to vector<8x32xf32>
      %65 = arith.mulf %55, %64 : vector<8x32xf32>
      %66 = vector.broadcast %48 : vector<1x32xf32> to vector<8x32xf32>
      %67 = arith.mulf %65, %66 : vector<8x32xf32>
      %68 = vector.broadcast %49 : vector<1x32xf32> to vector<8x32xf32>
      %69 = arith.addf %67, %68 : vector<8x32xf32>
      %c0_37 = arith.constant 0 : index
      %c0_38 = arith.constant 0 : index
      %c0_39 = arith.constant 0 : index
      %70 = vector.load %arg11[%c0_37, %c0_38, %c0_39] : memref<1x8x32xf32, #tpu.memory_space<vmem>>, vector<1x8x32xf32>
      %71 = vector.shape_cast %70 : vector<1x8x32xf32> to vector<8x32xf32>
      %72 = vector.shape_cast %69 : vector<8x32xf32> to vector<1x8x32xf32>
      tpu.vector_store %arg11[%c0_37, %c0_38, %c0_39], %72 {strides = array<i32>} : memref<1x8x32xf32, #tpu.memory_space<vmem>>, vector<1x8x32xf32>,
    } else {
    }
    return
  }
  func.func @transform_0(%arg0: i32, %arg1: i32, %arg2: i32) -> (i32, i32, i32, i32) {
    %c0_i32 = arith.constant 0 : i32
    %c0_i32_0 = arith.constant 0 : i32
    %c0_i32_1 = arith.constant 0 : i32
    return %arg0, %c0_i32, %arg1, %c0_i32_0 : i32, i32, i32, i32
  }
  func.func @transform_1(%arg0: i32, %arg1: i32, %arg2: i32) -> (i32, i32, i32, i32) {
    %c0_i32 = arith.constant 0 : i32
    %c0_i32_0 = arith.constant 0 : i32
    %c0_i32_1 = arith.constant 0 : i32
    %c0_i32_2 = arith.constant 0 : i32
    return %arg0, %c0_i32, %c0_i32_0, %c0_i32_1 : i32, i32, i32, i32
  }
  func.func @transform_2(%arg0: i32, %arg1: i32, %arg2: i32) -> (i32, i32, i32, i32) {
    %c0_i32 = arith.constant 0 : i32
    %c0_i32_0 = arith.constant 0 : i32
    %c0_i32_1 = arith.constant 0 : i32
    %c0_i32_2 = arith.constant 0 : i32
    return %arg0, %c0_i32, %c0_i32_0, %c0_i32_1 : i32, i32, i32, i32
  }
  func.func @transform_3(%arg0: i32, %arg1: i32, %arg2: i32) -> (i32, i32, i32) {
    %c0_i32 = arith.constant 0 : i32
    %c0_i32_0 = arith.constant 0 : i32
    %c0_i32_1 = arith.constant 0 : i32
    %c0_i32_2 = arith.constant 0 : i32
    return %c0_i32, %c0_i32_0, %c0_i32_1 : i32, i32, i32
  }
  func.func @transform_4(%arg0: i32, %arg1: i32, %arg2: i32) -> (i32, i32) {
    %c0_i32 = arith.constant 0 : i32
    %c0_i32_0 = arith.constant 0 : i32
    %c0_i32_1 = arith.constant 0 : i32
    return %c0_i32, %c0_i32_0 : i32, i32
  }
  func.func @transform_5(%arg0: i32, %arg1: i32, %arg2: i32) -> (i32, i32, i32) {
    %c0_i32 = arith.constant 0 : i32
    %c0_i32_0 = arith.constant 0 : i32
    return %arg0, %arg1, %c0_i32 : i32, i32, i32
  }
  func.func @transform_6(%arg0: i32, %arg1: i32, %arg2: i32) -> (i32, i32) {
    %c0_i32 = arith.constant 0 : i32
    %c0_i32_0 = arith.constant 0 : i32
    %c0_i32_1 = arith.constant 0 : i32
    return %c0_i32, %c0_i32_0 : i32, i32
  }
  func.func @transform_7(%arg0: i32, %arg1: i32, %arg2: i32) -> (i32, i32) {
    %c0_i32 = arith.constant 0 : i32
    %c0_i32_0 = arith.constant 0 : i32
    %c0_i32_1 = arith.constant 0 : i32
    return %c0_i32, %c0_i32_0 : i32, i32
  }
  func.func @transform_8(%arg0: i32, %arg1: i32, %arg2: i32) -> (i32, i32, i32) {
    %c0_i32 = arith.constant 0 : i32
    %c0_i32_0 = arith.constant 0 : i32
    return %arg0, %arg1, %c0_i32 : i32, i32, i32
  }
}

module attributes {stable_mosaic.version = 11 : i64} {
  func.func @_ffn_kernel(%arg0: i32, %arg1: i32, %arg2: memref<16x32xf32, #tpu.memory_space<vmem>>, %arg3: memref<32x64xf32, #tpu.memory_space<vmem>>, %arg4: memref<1x64xf32, #tpu.memory_space<vmem>>, %arg5: memref<64x32xf32, #tpu.memory_space<vmem>>, %arg6: memref<1x32xf32, #tpu.memory_space<vmem>>, %arg7: memref<1x32xf32, #tpu.memory_space<vmem>>, %arg8: memref<1x32xf32, #tpu.memory_space<vmem>>, %arg9: memref<16x32xf32, #tpu.memory_space<vmem>>, %arg10: memref<16x32xf32, #tpu.memory_space<vmem>>) attributes {dimension_semantics = [#tpu.dimension_semantics<parallel>, #tpu.dimension_semantics<arbitrary>], iteration_bounds = array<i64: 1, 1>, scalar_prefetch = 0 : i64, scratch_operands = 1 : i64, tpu.core_type = #tpu.core_type<tc>, window_params = [{transform_indices = @transform_0, window_bounds = array<i64: 16, 32>}, {transform_indices = @transform_1, window_bounds = array<i64: 32, 64>}, {transform_indices = @transform_2, window_bounds = array<i64: 1, 64>}, {transform_indices = @transform_3, window_bounds = array<i64: 64, 32>}, {pipeline_mode = #tpu.pipeline_mode<synchronous>, transform_indices = @transform_4, window_bounds = array<i64: 1, 32>}, {pipeline_mode = #tpu.pipeline_mode<synchronous>, transform_indices = @transform_5, window_bounds = array<i64: 1, 32>}, {pipeline_mode = #tpu.pipeline_mode<synchronous>, transform_indices = @transform_6, window_bounds = array<i64: 1, 32>}, {transform_indices = @transform_7, window_bounds = array<i64: 16, 32>}]} {
    %c0_i32 = arith.constant 0 : i32
    %0 = arith.cmpi eq, %arg1, %c0_i32 : i32
    %1 = arith.extui %0 : i1 to i32
    %c0_i32_0 = arith.constant 0 : i32
    %2 = arith.cmpi ne, %1, %c0_i32_0 : i32
    scf.if %2 {
      %cst_16 = arith.constant 0.000000e+00 : f32
      %23 = vector.broadcast %cst_16 : f32 to vector<16x32xf32>
      %c0_17 = arith.constant 0 : index
      %c0_18 = arith.constant 0 : index
      %24 = vector.load %arg10[%c0_17, %c0_18] : memref<16x32xf32, #tpu.memory_space<vmem>>, vector<16x32xf32>
      tpu.vector_store %arg10[%c0_17, %c0_18], %23 {strides = array<i32>} : memref<16x32xf32, #tpu.memory_space<vmem>>, vector<16x32xf32>,
    } else {
    }
    %c0 = arith.constant 0 : index
    %c0_1 = arith.constant 0 : index
    %3 = vector.load %arg2[%c0, %c0_1] : memref<16x32xf32, #tpu.memory_space<vmem>>, vector<16x32xf32>
    %4 = arith.truncf %3 : vector<16x32xf32> to vector<16x32xbf16>
    %c0_2 = arith.constant 0 : index
    %c0_3 = arith.constant 0 : index
    %5 = vector.load %arg3[%c0_2, %c0_3] : memref<32x64xf32, #tpu.memory_space<vmem>>, vector<32x64xf32>
    %6 = arith.truncf %5 : vector<32x64xf32> to vector<32x64xbf16>
    %cst = arith.constant dense<0.000000e+00> : vector<16x64xf32>
    %7 = tpu.matmul %4, %6, %cst {dimension_numbers = #tpu.dot_dimension_numbers<[1], [0], [0], [1], [0, 0, 1, 1], [], []>} : vector<16x32xbf16>, vector<32x64xbf16>, vector<16x64xf32> -> vector<16x64xf32>
    %c0_4 = arith.constant 0 : index
    %c0_5 = arith.constant 0 : index
    %8 = vector.load %arg4[%c0_4, %c0_5] : memref<1x64xf32, #tpu.memory_space<vmem>>, vector<1x64xf32>
    %9 = vector.broadcast %8 : vector<1x64xf32> to vector<16x64xf32>
    %10 = arith.addf %7, %9 : vector<16x64xf32>
    %cst_6 = arith.constant 0.000000e+00 : f32
    %11 = vector.broadcast %cst_6 : f32 to vector<16x64xf32>
    %12 = arith.maximumf %10, %11 : vector<16x64xf32>
    %c0_7 = arith.constant 0 : index
    %c0_8 = arith.constant 0 : index
    %13 = vector.load %arg10[%c0_7, %c0_8] : memref<16x32xf32, #tpu.memory_space<vmem>>, vector<16x32xf32>
    %14 = arith.truncf %12 : vector<16x64xf32> to vector<16x64xbf16>
    %c0_9 = arith.constant 0 : index
    %c0_10 = arith.constant 0 : index
    %15 = vector.load %arg5[%c0_9, %c0_10] : memref<64x32xf32, #tpu.memory_space<vmem>>, vector<64x32xf32>
    %16 = arith.truncf %15 : vector<64x32xf32> to vector<64x32xbf16>
    %cst_11 = arith.constant dense<0.000000e+00> : vector<16x32xf32>
    %17 = tpu.matmul %14, %16, %cst_11 {dimension_numbers = #tpu.dot_dimension_numbers<[1], [0], [0], [1], [0, 0, 1, 1], [], []>} : vector<16x64xbf16>, vector<64x32xbf16>, vector<16x32xf32> -> vector<16x32xf32>
    %18 = arith.addf %13, %17 : vector<16x32xf32>
    %c0_12 = arith.constant 0 : index
    %c0_13 = arith.constant 0 : index
    %19 = vector.load %arg10[%c0_12, %c0_13] : memref<16x32xf32, #tpu.memory_space<vmem>>, vector<16x32xf32>
    tpu.vector_store %arg10[%c0_12, %c0_13], %18 {strides = array<i32>} : memref<16x32xf32, #tpu.memory_space<vmem>>, vector<16x32xf32>,
    %c0_i32_14 = arith.constant 0 : i32
    %20 = arith.cmpi eq, %arg1, %c0_i32_14 : i32
    %21 = arith.extui %20 : i1 to i32
    %c0_i32_15 = arith.constant 0 : i32
    %22 = arith.cmpi ne, %21, %c0_i32_15 : i32
    scf.if %22 {
      %c0_16 = arith.constant 0 : index
      %c0_17 = arith.constant 0 : index
      %23 = vector.load %arg10[%c0_16, %c0_17] : memref<16x32xf32, #tpu.memory_space<vmem>>, vector<16x32xf32>
      %c0_18 = arith.constant 0 : index
      %c0_19 = arith.constant 0 : index
      %24 = vector.load %arg6[%c0_18, %c0_19] : memref<1x32xf32, #tpu.memory_space<vmem>>, vector<1x32xf32>
      %25 = vector.broadcast %24 : vector<1x32xf32> to vector<16x32xf32>
      %26 = arith.addf %23, %25 : vector<16x32xf32>
      %27 = arith.addf %26, %3 : vector<16x32xf32>
      %c0_20 = arith.constant 0 : index
      %c0_21 = arith.constant 0 : index
      %28 = vector.load %arg7[%c0_20, %c0_21] : memref<1x32xf32, #tpu.memory_space<vmem>>, vector<1x32xf32>
      %c0_22 = arith.constant 0 : index
      %c0_23 = arith.constant 0 : index
      %29 = vector.load %arg8[%c0_22, %c0_23] : memref<1x32xf32, #tpu.memory_space<vmem>>, vector<1x32xf32>
      %cst_24 = arith.constant dense<0.000000e+00> : vector<16xf32>
      %30 = vector.multi_reduction <add>, %27, %cst_24 [1] : vector<16x32xf32> to vector<16xf32>
      %31 = vector.shape_cast %30 : vector<16xf32> to vector<16x1xf32>
      %cst_25 = arith.constant 3.200000e+01 : f32
      %32 = vector.broadcast %cst_25 : f32 to vector<16x1xf32>
      %33 = arith.divf %31, %32 : vector<16x1xf32>
      %34 = vector.broadcast %33 : vector<16x1xf32> to vector<16x32xf32>
      %35 = arith.subf %27, %34 : vector<16x32xf32>
      %36 = arith.mulf %35, %35 : vector<16x32xf32>
      %cst_26 = arith.constant dense<0.000000e+00> : vector<16xf32>
      %37 = vector.multi_reduction <add>, %36, %cst_26 [1] : vector<16x32xf32> to vector<16xf32>
      %38 = vector.shape_cast %37 : vector<16xf32> to vector<16x1xf32>
      %cst_27 = arith.constant 3.200000e+01 : f32
      %39 = vector.broadcast %cst_27 : f32 to vector<16x1xf32>
      %40 = arith.divf %38, %39 : vector<16x1xf32>
      %cst_28 = arith.constant 9.99999974E-6 : f32
      %41 = vector.broadcast %cst_28 : f32 to vector<16x1xf32>
      %42 = arith.addf %40, %41 : vector<16x1xf32>
      %43 = math.rsqrt %42 : vector<16x1xf32>
      %44 = vector.broadcast %43 : vector<16x1xf32> to vector<16x32xf32>
      %45 = arith.mulf %35, %44 : vector<16x32xf32>
      %46 = vector.broadcast %28 : vector<1x32xf32> to vector<16x32xf32>
      %47 = arith.mulf %45, %46 : vector<16x32xf32>
      %48 = vector.broadcast %29 : vector<1x32xf32> to vector<16x32xf32>
      %49 = arith.addf %47, %48 : vector<16x32xf32>
      %c0_29 = arith.constant 0 : index
      %c0_30 = arith.constant 0 : index
      %50 = vector.load %arg9[%c0_29, %c0_30] : memref<16x32xf32, #tpu.memory_space<vmem>>, vector<16x32xf32>
      tpu.vector_store %arg9[%c0_29, %c0_30], %49 {strides = array<i32>} : memref<16x32xf32, #tpu.memory_space<vmem>>, vector<16x32xf32>,
    } else {
    }
    return
  }
  func.func @transform_0(%arg0: i32, %arg1: i32) -> (i32, i32) {
    %c0_i32 = arith.constant 0 : i32
    %c0_i32_0 = arith.constant 0 : i32
    return %arg0, %c0_i32 : i32, i32
  }
  func.func @transform_1(%arg0: i32, %arg1: i32) -> (i32, i32) {
    %c0_i32 = arith.constant 0 : i32
    %c0_i32_0 = arith.constant 0 : i32
    return %c0_i32, %arg1 : i32, i32
  }
  func.func @transform_2(%arg0: i32, %arg1: i32) -> (i32, i32) {
    %c0_i32 = arith.constant 0 : i32
    %c0_i32_0 = arith.constant 0 : i32
    return %c0_i32, %arg1 : i32, i32
  }
  func.func @transform_3(%arg0: i32, %arg1: i32) -> (i32, i32) {
    %c0_i32 = arith.constant 0 : i32
    %c0_i32_0 = arith.constant 0 : i32
    return %arg1, %c0_i32 : i32, i32
  }
  func.func @transform_4(%arg0: i32, %arg1: i32) -> (i32, i32) {
    %c0_i32 = arith.constant 0 : i32
    %c0_i32_0 = arith.constant 0 : i32
    %c0_i32_1 = arith.constant 0 : i32
    return %c0_i32, %c0_i32_0 : i32, i32
  }
  func.func @transform_5(%arg0: i32, %arg1: i32) -> (i32, i32) {
    %c0_i32 = arith.constant 0 : i32
    %c0_i32_0 = arith.constant 0 : i32
    %c0_i32_1 = arith.constant 0 : i32
    return %c0_i32, %c0_i32_0 : i32, i32
  }
  func.func @transform_6(%arg0: i32, %arg1: i32) -> (i32, i32) {
    %c0_i32 = arith.constant 0 : i32
    %c0_i32_0 = arith.constant 0 : i32
    %c0_i32_1 = arith.constant 0 : i32
    return %c0_i32, %c0_i32_0 : i32, i32
  }
  func.func @transform_7(%arg0: i32, %arg1: i32) -> (i32, i32) {
    %c0_i32 = arith.constant 0 : i32
    %c0_i32_0 = arith.constant 0 : i32
    return %arg0, %c0_i32 : i32, i32
  }
}

</mosaic_0001>

<bundles_post_ra>
// kernel: _lambda_.12
= control target key start
LH: loop header
LB: loop body
LE: loop exit
PB: predicated region body
PF: predicated region fallthrough
CT: control target
= control target key end

     0   :  { %8 = vsyncpa [#allocation4], 0  ;;  %s122_s15 = smov [#allocation3]   ;;  %s123_s17 = smov 128   ;;  %s176_s0 = inlined_call_operand.hbm [shape: f32[16,32], index: 0, kind: input, shape index: {}]   ;;  %s177_s1 = inlined_call_operand.vmem [shape: f32[32,96], index: 1, kind: input, shape index: {}]   ;;  %s178_s2 = inlined_call_operand.vmem [shape: f32[1,96], index: 2, kind: input, shape index: {}]   ;;  %s179_s3 = inlined_call_operand.vmem [shape: f32[16,96], index: 3, kind: output, shape index: {}]  }
   0x1   :  { %s13_s14 = sshll.u32 %s176_s0, 4  ;;  %s15_s16 = sshll.u32 %s122_s15, 4  ;;  %s14_s14 = int_to_ptr.hbm [resolvable:$true] %s13_s14  ;;  %s16_s16 = int_to_ptr.vmem [resolvable:$true] %s15_s16 }
   0x2   :  { %s124_s18 = smov 8  }
   0x3   :  { %21 = dma.hbm_to_vmem [thread:$0]  %s14_s14, 256, %s16_s16, [#allocation4], %s123_s17, %s123_s17, %s124_s18  }
   0x4   :  { %120 = dma.done.wait [#allocation4], 256  }
   0x5   :  { %121 = vsyncadd [#allocation4], 4294967040  ;;  %vm35_vm0 = vcmask 785408   ;;  %v125_v0 = vmov 0.0   ;;  %v45_v1 = vld [vmem:[%s177_s1 + $0x10] sm:$0xff]  ;;  %v46_v2 = vld [vmem:[%s177_s1 + $0x18] sm:$0xff] }
   0x6   :  { %36 = vst.msk [vmem:[#allocation2] sm:$0xff] %vm35_vm0, %v125_v0  ;;  %v43_v3 = vld [vmem:[%s177_s1] sm:$0xff]  ;;  %v48_v4 = vpack.c.bf16 %v46_v2, %v45_v1  ;;  %v44_v5 = vld [vmem:[%s177_s1 + $0x8] sm:$0xff]  ;;  %v40_v7 = vld [vmem:[#allocation3] sm:$0xff]  ;;  %vm49_vm1 = vcmask 261120  }
   0x7   :  { %37 = vst.msk [vmem:[#allocation2 + $0x8] sm:$0xff] %vm35_vm0, %v125_v0  ;;  %v47_v6 = vpack.c.bf16 %v44_v5, %v43_v3  ;;  %v41_v8 = vld [vmem:[#allocation3 + $0x8] sm:$0xff]  ;;  %v95_v14 = vld [vmem:[%s178_s2] ss:$0 sm:$0xff] }
   0x8   :  { %59 = vmatpush.bf16.msra.mxu0 %v48_v4  ;;  %v42_v9 = vpack.c.bf16 %v41_v8, %v40_v7 }
   0xc   :  { %60 = vmatpush.bf16.msra.mxu0 %v47_v6 }
   0xd   :  { %v38_v10 = vld [vmem:[#allocation2] sm:$0xff] }
   0xe   :  { %v39_v13 = vld [vmem:[#allocation2 + $0x8] sm:$0xff] }
   0xf   :  { %90 = vmatmul.msk.bf16.vlgmr.msra.gmra.mxu0 %vm49_vm1, %v42_v9 }
  0x8c   :  { %v62_v11 = vpop.f32.mrf.mxu0 }
  0x8d   :  { %v67_v12 = vadd.f32 %v62_v11, %v38_v10 }
  0x8f   :  { %70 = vst.msk [vmem:[#allocation2] sm:$0xff] %vm35_vm0, %v67_v12 }
  0x94   :  { %v64_v15 = vpop.f32.mrf.mxu0 }
  0x95   :  { %v68_v16 = vadd.f32 %v64_v15, %v39_v13 }
  0x96   :  { %v75_v17 = vld [vmem:[#allocation2] sm:$0xff] }
  0x97   :  { %v81_v18 = vadd.f32 %v95_v14, %v75_v17  ;;  %71 = vst.msk [vmem:[#allocation2 + $0x8] sm:$0xff] %vm35_vm0, %v68_v16 }
  0x99   :  { %83 = vst.msk [vmem:[%s179_s3] sm:$0xff] %vm35_vm0, %v81_v18 }
  0x9e   :  { %v76_v19 = vld [vmem:[#allocation2 + $0x8] sm:$0xff] }
  0x9f   :  { %v82_v20 = vadd.f32 %v95_v14, %v76_v19 }
  0xa1   :  { %84 = vst.msk [vmem:[%s179_s3 + $0x8] sm:$0xff] %vm35_vm0, %v82_v20 }
  0xa2   :  { %89 = vsyncpa [#allocation4], 1 }

// kernel: _lambda_.14
= control target key start
LH: loop header
LB: loop body
LE: loop exit
PB: predicated region body
PF: predicated region fallthrough
CT: control target
= control target key end

     0   :  { %vm19_vm0 = vcmask 261120   ;;  %v75_v3 = vmov 0.0   ;;  %s130_s1 = inlined_call_operand.vmem [shape: f32[32,32], index: 1, kind: input, shape index: {}]   ;;  %s131_s0 = inlined_call_operand.vmem [shape: f32[16,32], index: 0, kind: input, shape index: {}]   ;;  %s132_s2 = inlined_call_operand.vmem [shape: f32[1,32], index: 2, kind: input, shape index: {}]   ;;  %s133_s3 = inlined_call_operand.vmem [shape: f32[16,32], index: 3, kind: output, shape index: {}]  }
   0x1   :  { %v29_v0 = vld [vmem:[%s130_s1 + $0x10] sm:$0xff]  ;;  %v30_v1 = vld [vmem:[%s130_s1 + $0x18] sm:$0xff]  ;;  %v27_v2 = vld [vmem:[%s130_s1] sm:$0xff]  ;;  %20 = vst.msk [vmem:[#allocation2] sm:$0xff] %vm19_vm0, %v75_v3 }
   0x2   :  { %v32_v4 = vpack.c.bf16 %v30_v1, %v29_v0  ;;  %v28_v5 = vld [vmem:[%s130_s1 + $0x8] sm:$0xff]  ;;  %21 = vst.msk [vmem:[#allocation2 + $0x8] sm:$0xff] %vm19_vm0, %v75_v3  ;;  %v24_v7 = vld [vmem:[%s131_s0] sm:$0xff] }
   0x3   :  { %v31_v6 = vpack.c.bf16 %v28_v5, %v27_v2  ;;  %v25_v8 = vld [vmem:[%s131_s0 + $0x8] sm:$0xff]  ;;  %v74_v14 = vld [vmem:[%s132_s2] ss:$0 sm:$0xff] }
   0x4   :  { %43 = vmatpush.bf16.msra.mxu0 %v32_v4  ;;  %v26_v9 = vpack.c.bf16 %v25_v8, %v24_v7 }
   0x8   :  { %44 = vmatpush.bf16.msra.mxu0 %v31_v6  ;;  %v22_v10 = vld [vmem:[#allocation2] sm:$0xff] }
   0x9   :  { %v23_v13 = vld [vmem:[#allocation2 + $0x8] sm:$0xff] }
   0xb   :  { %72 = vmatmul.msk.bf16.vlgmr.msra.gmra.mxu0 %vm19_vm0, %v26_v9 }
  0x88   :  { %v46_v11 = vpop.f32.mrf.mxu0 }
  0x89   :  { %v51_v12 = vadd.f32 %v46_v11, %v22_v10 }
  0x8b   :  { %53 = vst.msk [vmem:[#allocation2] sm:$0xff] %vm19_vm0, %v51_v12 }
  0x90   :  { %v48_v15 = vpop.f32.mrf.mxu0 }
  0x91   :  { %v52_v16 = vadd.f32 %v48_v15, %v23_v13 }
  0x92   :  { %v58_v17 = vld [vmem:[#allocation2] sm:$0xff] }
  0x93   :  { %v64_v18 = vadd.f32 %v74_v14, %v58_v17  ;;  %54 = vst.msk [vmem:[#allocation2 + $0x8] sm:$0xff] %vm19_vm0, %v52_v16 }
  0x95   :  { %66 = vst.msk [vmem:[%s133_s3] sm:$0xff] %vm19_vm0, %v64_v18 }
  0x9a   :  { %v59_v19 = vld [vmem:[#allocation2 + $0x8] sm:$0xff] }
  0x9b   :  { %v65_v20 = vadd.f32 %v74_v14, %v59_v19 }
  0x9d   :  { %67 = vst.msk [vmem:[%s133_s3 + $0x8] sm:$0xff] %vm19_vm0, %v65_v20 }

// kernel: _lambda_.13
= control target key start
LH: loop header
LB: loop body
LE: loop exit
PB: predicated region body
PF: predicated region fallthrough
CT: control target
= control target key end

     0   :  { %s933_s30 = smov 0   ;;  %s935_s10 = smov 0   ;;  %s1047_s0 = inlined_call_operand.vmem [shape: f32[2,4,8,8], index: 0, kind: input, shape index: {}]   ;;  %s1048_s1 = inlined_call_operand.vmem [shape: f32[2,4,8,8], index: 1, kind: input, shape index: {}]   ;;  %s1049_s2 = inlined_call_operand.vmem [shape: f32[2,4,8,8], index: 2, kind: input, shape index: {}]   ;;  %s1050_s3 = inlined_call_operand.vmem [shape: f32[8,8], index: 3, kind: input, shape index: {}]   ;;  %s1051_s4 = inlined_call_operand.vmem [shape: f32[4,8,32], index: 4, kind: input, shape index: {}]   ;;  %s1052_s5 = inlined_call_operand.vmem [shape: f32[1,32], index: 5, kind: input, shape index: {}]   ;;  %s1053_s6 = inlined_call_operand.vmem [shape: f32[2,8,32], index: 6, kind: input, shape index: {}]   ;;  %s1054_s7 = inlined_call_operand.vmem [shape: f32[1,32], index: 7, kind: input, shape index: {}]   ;;  %s1055_s8 = inlined_call_operand.vmem [shape: f32[1,32], index: 8, kind: input, shape index: {}]   ;;  %s1056_s9 = inlined_call_operand.vmem [shape: f32[2,8,32], index: 9, kind: output, shape index: {}]  }
   0x1   :  { %s937_s11 = smov 0   ;;  %s939_s12 = smov 0  }
   0x2   :  { %s941_s13 = smov 0  }
   0x3 LB: > { %s31_s14 = sadd.s32 1, %s871_s11  ;;  %s38_s15 = sadd.s32 1, %s875_s12  ;;  %s879_s13 = sphi %s941_s13, %s19_s13   ;;  %s875_s12 = sphi %s939_s12, %s1064_s12   ;;  %s871_s11 = sphi %s937_s11, %s1063_s11   ;;  %s867_s10 = sphi %s935_s10, %s1062_s10   ;;  %s863_s30 = sphi %s933_s30, %s1061_s30  }
   0x4   : > { %p32_p0 = scmp.ge.s32.totalorder %s31_s14, 4  ;;  %p768_p1 = scmp.ge.s32.totalorder %s879_s13, 1 }
   0x5   : > { %p356_p2 = scmp.lt.s32.totalorder %s879_s13, 9 }
   0x6   : > { %s1066_s14 = smov (%p32_p0, %s31_s14), 0  ;;  %s1068_s15 = smov (!%p32_p0, %s38_s15), %s875_s12 }
   0x7   : > { %1057 = sst [smem:[#allocation3_spill]] %s1066_s14  ;;  %p357_p3 = pnand %p768_p1, %p356_p2 }
   0x8   : > { %p40_p4 = scmp.ge.s32.totalorder %s1068_s15, 2  ;;  %p418_p5 = scmp.lt.s32.totalorder (!%p357_p3), %s867_s10, 1 }
   0x9   : > { %360 = sbr.rel (%p357_p3) target bundleno = 971 (0x3cb), region = 56  ;;  %p777_p6 = scmp.ne.s32.totalorder (!%p357_p3), %s863_s30, 0 }
   0xa   : > { %s1070_s15 = smov (%p40_p4, %s1068_s15), 0 }
   0xb   : > { %1058 = sst [smem:[#allocation4_spill]] %s1070_s15 }
   0xe   : > { %s1072_s10 = smov (!%p418_p5, %s867_s10), 1  ;;  %458 = sbr.rel (%p777_p6) target bundleno = 21 (0x15), region = 60 }
   0xf   : > { %s965_s16 = sshll.u32 %s1072_s10, 5  ;;  %s775_s17 = sshll.u32 %s1072_s10, 3 }
  0x10   : > { %s425_s20 = scalar_lea.vmem %s1047_s0, %s965_s16  ;;  %s430_s23 = scalar_lea.vmem %s1048_s1, %s965_s16 }
  0x11   : > { %s435_s26 = scalar_lea.vmem %s1049_s2, %s965_s16  ;;  %s982_s29 = scalar_lea.vmem %s1053_s6, %s775_s17 }
  0x12   : > { %s987_s10 = scalar_lea.vmem %s1056_s9, %s775_s17 }
  0x13   : > { %vm459_vm0 = vcmask 261120   ;;  %v881_v0 = vmov 0.0  }
  0x14   : > { %460 = vst.msk [vmem:[#allocation2] sm:$0xff] %vm459_vm0, %v881_v0 }
  0x15 PF: > { %s991_s18 = sshll.u32 %s863_s30, 3  ;;  %vm473_vm1 = vcmask 64512   ;;  %v472_v7 = vld [vmem:[%s1050_s3] sm:$0xff]  ;;  %vm521_vm2 = vcmask 1043456   ;;  %vm563_vm7 = vcmask 261120   ;;  %p782_p7 = scmp.ne.s32.totalorder %s863_s30, 3 }
  0x16   : > { %s466_s19 = scalar_lea.vmem %s430_s23, %s991_s18  ;;  %s462_s21 = scalar_lea.vmem %s425_s20, %s991_s18 }
  0x17   : > { %v467_v1 = vld [vmem:[%s466_s19] sm:$0xff]  ;;  %s469_s22 = scalar_lea.vmem %s435_s26, %s991_s18  ;;  %s540_s24 = scalar_lea.vmem %s1051_s4, %s991_s18 }
  0x18   : > { %v463_v2 = vld [vmem:[%s462_s21] sm:$0xff]  ;;  %v468_v3 = vpack.c.bf16 %v467_v1, %v467_v1 }
  0x19   : > { %v464_v5 = vmul.f32 0.35355338, %v463_v2  ;;  %v470_v17 = vld [vmem:[%s469_s22] sm:$0xff] }
  0x1a   : > { %v478_v4 = vsel %vm473_vm1, %v468_v3, 0  ;;  %v471_v18 = vpack.c.bf16 %v470_v17, %v470_v17  ;;  %v541_v33 = vld [vmem:[%s540_s24] sm:$0xff] }
  0x1b   : > { %487 = vmatpush.bf16.xpose.msra.mxu0 %v478_v4  ;;  %v465_v6 = vpack.c.bf16 %v464_v5, %v464_v5  ;;  %v542_v34 = vpack.c.bf16 %v541_v33, %v541_v33  ;;  %v538_v39 = vld [vmem:[#allocation2] sm:$0xff] }
  0x1c   : > { %v523_v19 = vsel %vm521_vm2, %v471_v18, 0 }
  0x1d   : > { %532 = vmatpush.bf16.msra.mxu1 %v523_v19  ;;  %v547_v35 = vsel %vm521_vm2, %v542_v34, 0 }
  0x1e   : > { %556 = vmatpush.bf16.msra.mxu2 %v547_v35 }
  0x22   : > { %779 = vmatmul.msk.bf16.vlgmr.msra.gmra.mxu0 %vm473_vm1, %v465_v6 }
  0x9f   : > { %v489_v8 = vpop.f32.mrf.mxu0 }
  0xa0   : > { %v490_v9 = vadd.f32 %v489_v8, %v472_v7 }
  0xa2   : > { %v493_v10 = vsel %vm473_vm1, %v490_v9, -inf }
  0xa3   : > { %494 = vmax.xlane.f32.xlu0 %v493_v10 }
  0xa7   : > { %v491_v11 = vpop.f32.mrf.mxu0 }
 0x116   : > { %v495_v12 = vpop.xlane.xlu0 %494 }
 0x117   : > { %v496_v13 = vsub.f32 %v490_v9, %v495_v12 }
 0x119   : > { %v497_v14 = vmul.f32 1.442695, %v496_v13 }
 0x11b   : > { %830 = vpow2.f32 %v497_v14 }
 0x121   : > { %v831_v15 = vpop.eup %830 }
 0x122   : > { %v499_v16 = vsel %vm473_vm1, %v831_v15, 0.0 }
 0x123   : > { %500 = vadd.xlane.f32.xlu0 %v499_v16 }
 0x196   : > { %v501_v20 = vpop.xlane.xlu0 %500 }
 0x197   : > { %832 = vrcp.f32 %v501_v20  ;;  %v513_v24 = vand.u32 2147483648, %v501_v20  ;;  %v511_v26 = vand.u32 2147483647, %v501_v20  ;;  %vm507_vm4 = vweird.f32 %v501_v20 }
 0x199   : > { %v514_v28 = vor.u32 1.1754944e-38, %v513_v24  ;;  %vm512_vm6 = vcmp.eq.f32.partialorder %v511_v26, 8.507059e+37 }
 0x19d   : > { %v833_v21 = vpop.eup %832 }
 0x19e   : > { %v503_v22 = vmul.f32 %v833_v21, %v501_v20  ;;  %vm508_vm3 = vweird.f32 %v833_v21 }
 0x19f   : > { %vm509_vm5 = vmor %vm507_vm4, %vm508_vm3 }
 0x1a0   : > { %v504_v23 = vsub.f32 1.0, %v503_v22 }
 0x1a2   : > { %v505_v25 = vmul.f32 %v833_v21, %v504_v23 }
 0x1a4   : > { %v506_v27 = vadd.f32 %v833_v21, %v505_v25 }
 0x1a6   : > { %v510_v29 = vsel %vm509_vm5, %v833_v21, %v506_v27 }
 0x1a7   : > { %v515_v30 = vsel %vm512_vm6, %v514_v28, %v510_v29 }
 0x1a8   : > { %v516_v31 = vmul.f32 %v831_v15, %v515_v30 }
 0x1aa   : > { %v517_v32 = vpack.c.bf16 %v516_v31, %v516_v31 }
 0x1ac   : > { %780 = vmatmul.msk.bf16.vlgmr.msra.gmra.mxu1 %vm473_vm1, %v517_v32 }
 0x229   : > { %v534_v36 = vpop.f32.mrf.mxu1 }
 0x22a   : > { %v539_v37 = vpack.c.bf16 %v534_v36, %v534_v36 }
 0x22c   : > { %781 = vmatmul.msk.bf16.vlgmr.msra.gmra.mxu2 %vm473_vm1, %v539_v37 }
 0x231   : > { %v536_v38 = vpop.f32.mrf.mxu1 }
 0x2af   : > { %v558_v40 = vpop.f32.mrf.mxu2 }
 0x2b0   : > { %v562_v41 = vadd.f32 %v558_v40, %v538_v39 }
 0x2b2   : > { %564 = vst.msk [vmem:[#allocation2] sm:$0xff] %vm563_vm7, %v562_v41 }
 0x2b3   : > { %568 = sbr.rel (%p782_p7) target bundleno = 971 (0x3cb), region = 64 }
 0x2b7   : > { %v560_v42 = vpop.f32.mrf.mxu2 }
 0x2b8   : > { %v834_v44 = vld [vmem:[%s1052_s5] ss:$0 sm:$0xff]  ;;  %v882_v49 = vmov 32.0  }
 0x2b9   : > { %v569_v43 = vld [vmem:[#allocation2] sm:$0xff]  ;;  %837 = vrcp.f32 %v882_v49 }
 0x2ba   : > { %v575_v45 = vld [vmem:[%s982_s29] sm:$0xff]  ;;  %v574_v46 = vadd.f32 %v834_v44, %v569_v43 }
 0x2bb   : > { %v835_v6 = vld [vmem:[%s1054_s7] ss:$0 sm:$0xff] }
 0x2bc   : > { %v576_v47 = vadd.f32 %v575_v45, %v574_v46  ;;  %v836_v8 = vld [vmem:[%s1055_s8] ss:$0 sm:$0xff] }
 0x2be   : > { %v579_v48 = vsel %vm563_vm7, %v576_v47, 0.0 }
 0x2bf   : > { %580 = vadd.xlane.f32.xlu0 %v579_v48  ;;  %v838_v50 = vpop.eup %837 }
 0x2c0   : > { %v583_v51 = vmul.f32 32.0, %v838_v50  ;;  %vm587_vm8 = vweird.f32 %v838_v50 }
 0x2c2   : > { %v584_v52 = vsub.f32 1.0, %v583_v51 }
 0x2c4   : > { %v585_v53 = vmul.f32 %v838_v50, %v584_v52 }
 0x2c6   : > { %v586_v54 = vadd.f32 %v838_v50, %v585_v53 }
 0x2c8   : > { %v588_v55 = vsel %vm587_vm8, %v838_v50, %v586_v54 }
 0x332   : > { %v581_v56 = vpop.xlane.xlu0 %580 }
 0x333   : > { %v589_v57 = vmul.f32 %v588_v55, %v581_v56 }
 0x335   : > { %v590_v58 = vsub.f32 %v576_v47, %v589_v57 }
 0x337   : > { %v591_v59 = vmul.f32 %v590_v58, %v590_v58 }
 0x339   : > { %v592_v60 = vsel %vm563_vm7, %v591_v59, 0.0 }
 0x33a   : > { %593 = vadd.xlane.f32.xlu0 %v592_v60 }
 0x3ad   : > { %v594_v61 = vpop.xlane.xlu0 %593 }
 0x3ae   : > { %v595_v62 = vmul.f32 %v594_v61, %v588_v55 }
 0x3b0   : > { %v596_v63 = vadd.f32 1e-05, %v595_v62 }
 0x3b2   : > { %839 = vrsqrt.f32 %v596_v63  ;;  %vm603_vm10 = vweird.f32 %v596_v63 }
 0x3b8   : > { %v840_v0 = vpop.eup %839 }
 0x3b9   : > { %v598_v1 = vmul.f32 %v840_v0, %v596_v63  ;;  %vm604_vm9 = vweird.f32 %v840_v0 }
 0x3ba   : > { %vm605_vm11 = vmor %vm603_vm10, %vm604_vm9 }
 0x3bb   : > { %v599_v2 = vmul.f32 %v840_v0, %v598_v1 }
 0x3bd   : > { %v600_v3 = vmul.f32 0.5, %v599_v2 }
 0x3bf   : > { %v601_v4 = vsub.f32 1.5, %v600_v3 }
 0x3c1   : > { %v602_v5 = vmul.f32 %v840_v0, %v601_v4 }
 0x3c3   : > { %v606_v7 = vsel %vm605_vm11, %v840_v0, %v602_v5 }
 0x3c4   : > { %v607_v9 = vmul.f32 %v606_v7, %v590_v58 }
 0x3c6   : > { %v611_v10 = vmul.f32 %v835_v6, %v607_v9 }
 0x3c8   : > { %v615_v11 = vadd.f32 %v836_v8, %v611_v10 }
 0x3ca   : > { %616 = vst.msk [vmem:[%s987_s10] sm:$0xff] %vm563_vm7, %v615_v11 }
 0x3cb PF: > { %s19_s13 = sadd.s32 1, %s879_s13   ;;  %s1059_s18 = sld [smem:[#allocation3_spill]] }
 0x3cc   : > { %p16_p8 = scmp.ge.s32.totalorder %s19_s13, 10   ;;  %s1060_s19 = sld [smem:[#allocation4_spill]] }
 0x3cd   : > { %s1061_s30 = smov %s871_s11  ;;  %s1062_s10 = smov %s875_s12 }
 0x3ce   :  { %18 = sbr.rel (!%p16_p8) target bundleno = 3 (0x3), region = 110 }
 0x3d1   : > { %s1063_s11 = smov %s1059_s18 }
 0x3d2   : > { %s1064_s12 = smov %s1060_s19 }

// kernel: _lambda_.15
= control target key start
LH: loop header
LB: loop body
LE: loop exit
PB: predicated region body
PF: predicated region fallthrough
CT: control target
= control target key end

     0   :  { %vm19_vm0 = vcmask 523264   ;;  %v76_v3 = vmov 0.0   ;;  %vm33_vm1 = vcmask 261120   ;;  %s130_s1 = inlined_call_operand.vmem [shape: f32[32,64], index: 1, kind: input, shape index: {}]   ;;  %s131_s0 = inlined_call_operand.vmem [shape: f32[16,32], index: 0, kind: input, shape index: {}]   ;;  %s132_s2 = inlined_call_operand.vmem [shape: f32[1,64], index: 2, kind: input, shape index: {}]   ;;  %s133_s3 = inlined_call_operand.vmem [shape: f32[16,64], index: 3, kind: output, shape index: {}]  }
   0x1   :  { %v29_v0 = vld [vmem:[%s130_s1 + $0x10] sm:$0xff]  ;;  %v30_v1 = vld [vmem:[%s130_s1 + $0x18] sm:$0xff]  ;;  %v27_v2 = vld [vmem:[%s130_s1] sm:$0xff]  ;;  %20 = vst.msk [vmem:[#allocation2] sm:$0xff] %vm19_vm0, %v76_v3 }
   0x2   :  { %v32_v4 = vpack.c.bf16 %v30_v1, %v29_v0  ;;  %v28_v5 = vld [vmem:[%s130_s1 + $0x8] sm:$0xff]  ;;  %21 = vst.msk [vmem:[#allocation2 + $0x8] sm:$0xff] %vm19_vm0, %v76_v3  ;;  %v24_v7 = vld [vmem:[%s131_s0] sm:$0xff] }
   0x3   :  { %v31_v6 = vpack.c.bf16 %v28_v5, %v27_v2  ;;  %v25_v8 = vld [vmem:[%s131_s0 + $0x8] sm:$0xff]  ;;  %v75_v14 = vld [vmem:[%s132_s2] ss:$0 sm:$0xff] }
   0x4   :  { %43 = vmatpush.bf16.msra.mxu0 %v32_v4  ;;  %v26_v9 = vpack.c.bf16 %v25_v8, %v24_v7 }
   0x8   :  { %44 = vmatpush.bf16.msra.mxu0 %v31_v6  ;;  %v22_v10 = vld [vmem:[#allocation2] sm:$0xff] }
   0x9   :  { %v23_v13 = vld [vmem:[#allocation2 + $0x8] sm:$0xff] }
   0xb   :  { %73 = vmatmul.msk.bf16.vlgmr.msra.gmra.mxu0 %vm33_vm1, %v26_v9 }
  0x88   :  { %v46_v11 = vpop.f32.mrf.mxu0 }
  0x89   :  { %v51_v12 = vadd.f32 %v46_v11, %v22_v10 }
  0x8b   :  { %54 = vst.msk [vmem:[#allocation2] sm:$0xff] %vm19_vm0, %v51_v12 }
  0x90   :  { %v48_v15 = vpop.f32.mrf.mxu0 }
  0x91   :  { %v52_v16 = vadd.f32 %v48_v15, %v23_v13 }
  0x92   :  { %v59_v17 = vld [vmem:[#allocation2] sm:$0xff] }
  0x93   :  { %v65_v18 = vadd.f32 %v75_v14, %v59_v17  ;;  %55 = vst.msk [vmem:[#allocation2 + $0x8] sm:$0xff] %vm19_vm0, %v52_v16 }
  0x95   :  { %67 = vst.msk [vmem:[%s133_s3] sm:$0xff] %vm19_vm0, %v65_v18 }
  0x9a   :  { %v60_v19 = vld [vmem:[#allocation2 + $0x8] sm:$0xff] }
  0x9b   :  { %v66_v20 = vadd.f32 %v75_v14, %v60_v19 }
  0x9d   :  { %68 = vst.msk [vmem:[%s133_s3 + $0x8] sm:$0xff] %vm19_vm0, %v66_v20 }

// kernel: _lambda_.18
= control target key start
LH: loop header
LB: loop body
LE: loop exit
PB: predicated region body
PF: predicated region fallthrough
CT: control target
= control target key end

     0   :  { %vm19_vm0 = vcmask 785408   ;;  %v76_v3 = vmov 0.0   ;;  %vm33_vm1 = vcmask 261120   ;;  %s130_s1 = inlined_call_operand.vmem [shape: f32[32,96], index: 1, kind: input, shape index: {}]   ;;  %s131_s0 = inlined_call_operand.vmem [shape: f32[16,32], index: 0, kind: input, shape index: {}]   ;;  %s132_s2 = inlined_call_operand.vmem [shape: f32[1,96], index: 2, kind: input, shape index: {}]   ;;  %s133_s3 = inlined_call_operand.vmem [shape: f32[16,96], index: 3, kind: output, shape index: {}]  }
   0x1   :  { %v29_v0 = vld [vmem:[%s130_s1 + $0x10] sm:$0xff]  ;;  %v30_v1 = vld [vmem:[%s130_s1 + $0x18] sm:$0xff]  ;;  %v27_v2 = vld [vmem:[%s130_s1] sm:$0xff]  ;;  %20 = vst.msk [vmem:[#allocation2] sm:$0xff] %vm19_vm0, %v76_v3 }
   0x2   :  { %v32_v4 = vpack.c.bf16 %v30_v1, %v29_v0  ;;  %v28_v5 = vld [vmem:[%s130_s1 + $0x8] sm:$0xff]  ;;  %21 = vst.msk [vmem:[#allocation2 + $0x8] sm:$0xff] %vm19_vm0, %v76_v3  ;;  %v24_v7 = vld [vmem:[%s131_s0] sm:$0xff] }
   0x3   :  { %v31_v6 = vpack.c.bf16 %v28_v5, %v27_v2  ;;  %v25_v8 = vld [vmem:[%s131_s0 + $0x8] sm:$0xff]  ;;  %v75_v14 = vld [vmem:[%s132_s2] ss:$0 sm:$0xff] }
   0x4   :  { %43 = vmatpush.bf16.msra.mxu0 %v32_v4  ;;  %v26_v9 = vpack.c.bf16 %v25_v8, %v24_v7 }
   0x8   :  { %44 = vmatpush.bf16.msra.mxu0 %v31_v6  ;;  %v22_v10 = vld [vmem:[#allocation2] sm:$0xff] }
   0x9   :  { %v23_v13 = vld [vmem:[#allocation2 + $0x8] sm:$0xff] }
   0xb   :  { %73 = vmatmul.msk.bf16.vlgmr.msra.gmra.mxu0 %vm33_vm1, %v26_v9 }
  0x88   :  { %v46_v11 = vpop.f32.mrf.mxu0 }
  0x89   :  { %v51_v12 = vadd.f32 %v46_v11, %v22_v10 }
  0x8b   :  { %54 = vst.msk [vmem:[#allocation2] sm:$0xff] %vm19_vm0, %v51_v12 }
  0x90   :  { %v48_v15 = vpop.f32.mrf.mxu0 }
  0x91   :  { %v52_v16 = vadd.f32 %v48_v15, %v23_v13 }
  0x92   :  { %v59_v17 = vld [vmem:[#allocation2] sm:$0xff] }
  0x93   :  { %v65_v18 = vadd.f32 %v75_v14, %v59_v17  ;;  %55 = vst.msk [vmem:[#allocation2 + $0x8] sm:$0xff] %vm19_vm0, %v52_v16 }
  0x95   :  { %67 = vst.msk [vmem:[%s133_s3] sm:$0xff] %vm19_vm0, %v65_v18 }
  0x9a   :  { %v60_v19 = vld [vmem:[#allocation2 + $0x8] sm:$0xff] }
  0x9b   :  { %v66_v20 = vadd.f32 %v75_v14, %v60_v19 }
  0x9d   :  { %68 = vst.msk [vmem:[%s133_s3 + $0x8] sm:$0xff] %vm19_vm0, %v66_v20 }

// kernel: _lambda_.17
= control target key start
LH: loop header
LB: loop body
LE: loop exit
PB: predicated region body
PF: predicated region fallthrough
CT: control target
= control target key end

     0   :  { %vm31_vm0 = vcmask 261120   ;;  %v200_v21 = vmov 0.0   ;;  %vm82_vm1 = vcmask 523264   ;;  %v201_v45 = vmov 32.0   ;;  %s313_s1 = inlined_call_operand.vmem [shape: f32[32,64], index: 1, kind: input, shape index: {}]   ;;  %s314_s0 = inlined_call_operand.vmem [shape: f32[16,32], index: 0, kind: input, shape index: {}]   ;;  %s315_s2 = inlined_call_operand.vmem [shape: f32[1,64], index: 2, kind: input, shape index: {}]   ;;  %s316_s3 = inlined_call_operand.vmem [shape: f32[64,32], index: 3, kind: input, shape index: {}]   ;;  %s317_s4 = inlined_call_operand.vmem [shape: f32[1,32], index: 4, kind: input, shape index: {}]   ;;  %s318_s5 = inlined_call_operand.vmem [shape: f32[1,32], index: 5, kind: input, shape index: {}]   ;;  %s319_s6 = inlined_call_operand.vmem [shape: f32[1,32], index: 6, kind: input, shape index: {}]   ;;  %s320_s7 = inlined_call_operand.vmem [shape: f32[16,32], index: 7, kind: output, shape index: {}]  }
   0x1   :  { %v39_v0 = vld [vmem:[%s313_s1 + $0x10] sm:$0xff]  ;;  %v40_v1 = vld [vmem:[%s313_s1 + $0x18] sm:$0xff]  ;;  %v37_v2 = vld [vmem:[%s313_s1] sm:$0xff]  ;;  %32 = vst.msk [vmem:[#allocation2] sm:$0xff] %vm31_vm0, %v200_v21  ;;  %194 = vrcp.f32 %v201_v45 }
   0x2   :  { %v42_v3 = vpack.c.bf16 %v40_v1, %v39_v0  ;;  %v38_v4 = vld [vmem:[%s313_s1 + $0x8] sm:$0xff]  ;;  %v34_v6 = vld [vmem:[%s314_s0] sm:$0xff]  ;;  %v76_v9 = vld [vmem:[%s316_s3 + $0x30] sm:$0xff]  ;;  %33 = vst.msk [vmem:[#allocation2 + $0x8] sm:$0xff] %vm31_vm0, %v200_v21 }
   0x3   :  { %v41_v5 = vpack.c.bf16 %v38_v4, %v37_v2  ;;  %v35_v7 = vld [vmem:[%s314_s0 + $0x8] sm:$0xff]  ;;  %v77_v10 = vld [vmem:[%s316_s3 + $0x38] sm:$0xff]  ;;  %v74_v12 = vld [vmem:[%s316_s3 + $0x20] sm:$0xff] }
   0x4   :  { %57 = vmatpush.bf16.msra.mxu0 %v42_v3  ;;  %v36_v8 = vpack.c.bf16 %v35_v7, %v34_v6  ;;  %v81_v11 = vpack.c.bf16 %v77_v10, %v76_v9  ;;  %v75_v13 = vld [vmem:[%s316_s3 + $0x28] sm:$0xff]  ;;  %v72_v15 = vld [vmem:[%s316_s3 + $0x10] sm:$0xff]  ;;  %v73_v16 = vld [vmem:[%s316_s3 + $0x18] sm:$0xff] }
   0x5   :  { %v80_v14 = vpack.c.bf16 %v75_v13, %v74_v12  ;;  %v79_v17 = vpack.c.bf16 %v73_v16, %v72_v15  ;;  %v70_v18 = vld [vmem:[%s316_s3] sm:$0xff]  ;;  %v71_v19 = vld [vmem:[%s316_s3 + $0x8] sm:$0xff] }
   0x6   :  { %90 = vmatpush.bf16.msra.mxu1 %v81_v11  ;;  %v78_v20 = vpack.c.bf16 %v71_v19, %v70_v18  ;;  %v190_v23 = vld [vmem:[%s315_s2] ss:$0 sm:$0xff] }
   0x7   :  { %v191_v34 = vld [vmem:[%s317_s4] ss:$0 sm:$0xff]  ;;  %v195_v46 = vpop.eup %194 }
   0x8   :  { %58 = vmatpush.bf16.msra.mxu0 %v41_v5  ;;  %v67_v30 = vld [vmem:[#allocation2] sm:$0xff]  ;;  %v126_v47 = vmul.f32 32.0, %v195_v46  ;;  %vm130_vm2 = vweird.f32 %v195_v46 }
   0x9   :  { %v68_v33 = vld [vmem:[#allocation2 + $0x8] sm:$0xff]  ;;  %v192_v12 = vld [vmem:[%s318_s5] ss:$0 sm:$0xff] }
   0xa   :  { %91 = vmatpush.bf16.msra.mxu1 %v80_v14  ;;  %v127_v48 = vsub.f32 1.0, %v126_v47  ;;  %v193_v15 = vld [vmem:[%s319_s6] ss:$0 sm:$0xff] }
   0xb   :  { %186 = vmatmul.msk.bf16.vlgmr.msra.gmra.mxu0 %vm31_vm0, %v36_v8 }
   0xc   :  { %v128_v49 = vmul.f32 %v195_v46, %v127_v48 }
   0xe   :  { %92 = vmatpush.bf16.msra.mxu1 %v79_v17  ;;  %v129_v50 = vadd.f32 %v195_v46, %v128_v49 }
  0x10   :  { %v131_v51 = vsel %vm130_vm2, %v195_v46, %v129_v50 }
  0x12   :  { %93 = vmatpush.bf16.msra.mxu1 %v78_v20 }
  0x88   :  { %v60_v22 = vpop.f32.mrf.mxu0 }
  0x89   :  { %v61_v24 = vadd.f32 %v190_v23, %v60_v22 }
  0x8b   :  { %v65_v27 = vmax.f32 %v61_v24, 0.0 }
  0x90   :  { %v62_v25 = vpop.f32.mrf.mxu0 }
  0x91   :  { %v63_v26 = vadd.f32 %v190_v23, %v62_v25 }
  0x93   :  { %v66_v28 = vmax.f32 %v63_v26, 0.0 }
  0x95   :  { %v69_v29 = vpack.c.bf16 %v66_v28, %v65_v27 }
  0x97   :  { %187 = vmatmul.msk.bf16.vlgmr.msra.gmra.mxu1 %vm82_vm1, %v69_v29 }
 0x114   :  { %v95_v31 = vpop.f32.mrf.mxu1 }
 0x115   :  { %v100_v32 = vadd.f32 %v95_v31, %v67_v30 }
 0x117   :  { %102 = vst.msk [vmem:[#allocation2] sm:$0xff] %vm31_vm0, %v100_v32 }
 0x11c   :  { %v97_v35 = vpop.f32.mrf.mxu1 }
 0x11d   :  { %v101_v36 = vadd.f32 %v97_v35, %v68_v33 }
 0x11e   :  { %v107_v37 = vld [vmem:[#allocation2] sm:$0xff] }
 0x11f   :  { %103 = vst.msk [vmem:[#allocation2 + $0x8] sm:$0xff] %vm31_vm0, %v101_v36  ;;  %v113_v38 = vadd.f32 %v191_v34, %v107_v37 }
 0x121   :  { %v115_v39 = vadd.f32 %v113_v38, %v34_v6 }
 0x123   :  { %v119_v40 = vsel %vm31_vm0, %v115_v39, 0.0 }
 0x124   :  { %120 = vadd.xlane.f32.xlu0 %v119_v40 }
 0x126   :  { %v108_v41 = vld [vmem:[#allocation2 + $0x8] sm:$0xff] }
 0x127   :  { %v114_v42 = vadd.f32 %v191_v34, %v108_v41 }
 0x129   :  { %v116_v43 = vadd.f32 %v114_v42, %v35_v7 }
 0x12b   :  { %v122_v44 = vsel %vm31_vm0, %v116_v43, 0.0 }
 0x12c   :  { %123 = vadd.xlane.f32.xlu0 %v122_v44 }
 0x197   :  { %v121_v52 = vpop.xlane.xlu0 %120 }
 0x198   :  { %v132_v53 = vmul.f32 %v131_v51, %v121_v52 }
 0x19a   :  { %v134_v54 = vsub.f32 %v115_v39, %v132_v53 }
 0x19c   :  { %v136_v55 = vmul.f32 %v134_v54, %v134_v54 }
 0x19e   :  { %v138_v56 = vsel %vm31_vm0, %v136_v55, 0.0 }
 0x19f   :  { %139 = vadd.xlane.f32.xlu1 %v138_v56  ;;  %v124_v57 = vpop.xlane.xlu0 %123 }
 0x1a0   :  { %v133_v58 = vmul.f32 %v131_v51, %v124_v57 }
 0x1a2   :  { %v135_v59 = vsub.f32 %v116_v43, %v133_v58 }
 0x1a4   :  { %v137_v60 = vmul.f32 %v135_v59, %v135_v59 }
 0x1a6   :  { %v141_v61 = vsel %vm31_vm0, %v137_v60, 0.0 }
 0x1a7   :  { %142 = vadd.xlane.f32.xlu1 %v141_v61 }
 0x212   :  { %v140_v62 = vpop.xlane.xlu1 %139 }
 0x213   :  { %v144_v63 = vmul.f32 %v140_v62, %v131_v51 }
 0x215   :  { %v146_v0 = vadd.f32 1e-05, %v144_v63 }
 0x217   :  { %196 = vrsqrt.f32 %v146_v0  ;;  %vm154_vm4 = vweird.f32 %v146_v0 }
 0x21a   :  { %v143_v1 = vpop.xlane.xlu1 %142 }
 0x21b   :  { %v145_v2 = vmul.f32 %v143_v1, %v131_v51 }
 0x21d   :  { %v197_v3 = vpop.eup %196  ;;  %v147_v4 = vadd.f32 1e-05, %v145_v2 }
 0x21e   :  { %v149_v5 = vmul.f32 %v197_v3, %v146_v0  ;;  %vm155_vm3 = vweird.f32 %v197_v3 }
 0x21f   :  { %198 = vrsqrt.f32 %v147_v4  ;;  %vm156_vm5 = vmor %vm154_vm4, %vm155_vm3  ;;  %vm164_vm7 = vweird.f32 %v147_v4 }
 0x220   :  { %v150_v6 = vmul.f32 %v197_v3, %v149_v5 }
 0x222   :  { %v151_v7 = vmul.f32 0.5, %v150_v6 }
 0x224   :  { %v152_v8 = vsub.f32 1.5, %v151_v7 }
 0x225   :  { %v199_v9 = vpop.eup %198 }
 0x226   :  { %v153_v10 = vmul.f32 %v197_v3, %v152_v8  ;;  %v159_v11 = vmul.f32 %v199_v9, %v147_v4  ;;  %vm165_vm6 = vweird.f32 %v199_v9 }
 0x227   :  { %vm166_vm8 = vmor %vm164_vm7, %vm165_vm6 }
 0x228   :  { %v157_v13 = vsel %vm156_vm5, %v197_v3, %v153_v10  ;;  %v160_v14 = vmul.f32 %v199_v9, %v159_v11 }
 0x229   :  { %v168_v16 = vmul.f32 %v157_v13, %v134_v54 }
 0x22a   :  { %v161_v17 = vmul.f32 0.5, %v160_v14 }
 0x22b   :  { %v173_v18 = vmul.f32 %v192_v12, %v168_v16 }
 0x22c   :  { %v162_v19 = vsub.f32 1.5, %v161_v17 }
 0x22d   :  { %v178_v20 = vadd.f32 %v193_v15, %v173_v18 }
 0x22e   :  { %v163_v21 = vmul.f32 %v199_v9, %v162_v19 }
 0x22f   :  { %180 = vst.msk [vmem:[%s320_s7] sm:$0xff] %vm31_vm0, %v178_v20 }
 0x230   :  { %v167_v22 = vsel %vm166_vm8, %v199_v9, %v163_v21 }
 0x231   :  { %v169_v23 = vmul.f32 %v167_v22, %v135_v59 }
 0x233   :  { %v174_v24 = vmul.f32 %v192_v12, %v169_v23 }
 0x235   :  { %v179_v25 = vadd.f32 %v193_v15, %v174_v24 }
 0x237   :  { %181 = vst.msk [vmem:[%s320_s7 + $0x8] sm:$0xff] %vm31_vm0, %v179_v25 }

// kernel: _lambda_.23
= control target key start
LH: loop header
LB: loop body
LE: loop exit
PB: predicated region body
PF: predicated region fallthrough
CT: control target
= control target key end

     0   :  { %s357_s0 = inlined_call_operand.vmem [shape: f32[16,32], index: 0, kind: input, shape index: {}]   ;;  %s358_s1 = inlined_call_operand.vmem [shape: f32[32,64], index: 1, kind: input, shape index: {}]   ;;  %s359_s2 = inlined_call_operand.vmem [shape: f32[1,64], index: 2, kind: input, shape index: {}]   ;;  %s360_s3 = inlined_call_operand.vmem [shape: f32[64,32], index: 3, kind: input, shape index: {}]   ;;  %s361_s4 = inlined_call_operand.vmem [shape: f32[1,32], index: 4, kind: input, shape index: {}]   ;;  %s362_s5 = inlined_call_operand.vmem [shape: f32[1,32], index: 5, kind: input, shape index: {}]   ;;  %s363_s6 = inlined_call_operand.vmem [shape: f32[1,32], index: 6, kind: input, shape index: {}]   ;;  %s364_s7 = inlined_call_operand.hbm [shape: f32[16,32], index: 7, kind: output, shape index: {}]  }
   0x1   :  { %v40_v0 = vld [vmem:[%s358_s1 + $0x10] sm:$0xff]  ;;  %v41_v1 = vld [vmem:[%s358_s1 + $0x18] sm:$0xff]  ;;  %v38_v2 = vld [vmem:[%s358_s1] sm:$0xff] }
   0x2   :  { %v43_v3 = vpack.c.bf16 %v41_v1, %v40_v0  ;;  %v39_v4 = vld [vmem:[%s358_s1 + $0x8] sm:$0xff]  ;;  %v35_v5 = vld [vmem:[%s357_s0] sm:$0xff] }
   0x3   :  { %v36_v6 = vld [vmem:[%s357_s0 + $0x8] sm:$0xff]  ;;  %v42_v7 = vpack.c.bf16 %v39_v4, %v38_v2 }
   0x4   :  { %58 = vmatpush.bf16.msra.mxu0 %v43_v3 }
   0x5   :  { %12 = vsyncpa [#allocation4], 0  ;;  %v37_v8 = vpack.c.bf16 %v36_v6, %v35_v5  ;;  %vm32_vm0 = vcmask 261120   ;;  %v77_v9 = vld [vmem:[%s360_s3 + $0x30] sm:$0xff]  ;;  %v78_v10 = vld [vmem:[%s360_s3 + $0x38] sm:$0xff]  ;;  %v244_v21 = vmov 0.0  }
   0x6   :  { %v82_v11 = vpack.c.bf16 %v78_v10, %v77_v9  ;;  %v75_v12 = vld [vmem:[%s360_s3 + $0x20] sm:$0xff]  ;;  %v76_v13 = vld [vmem:[%s360_s3 + $0x28] sm:$0xff]  ;;  %v73_v15 = vld [vmem:[%s360_s3 + $0x10] sm:$0xff]  ;;  %33 = vst.msk [vmem:[#allocation2] sm:$0xff] %vm32_vm0, %v244_v21  ;;  %vm83_vm1 = vcmask 523264   ;;  %v245_v45 = vmov 32.0  }
   0x7   :  { %v81_v14 = vpack.c.bf16 %v76_v13, %v75_v12  ;;  %v74_v16 = vld [vmem:[%s360_s3 + $0x18] sm:$0xff]  ;;  %v71_v18 = vld [vmem:[%s360_s3] sm:$0xff]  ;;  %v72_v19 = vld [vmem:[%s360_s3 + $0x8] sm:$0xff]  ;;  %34 = vst.msk [vmem:[#allocation2 + $0x8] sm:$0xff] %vm32_vm0, %v244_v21  ;;  %212 = vrcp.f32 %v245_v45  ;;  %s189_s12 = sshll.u32 %s364_s7, 4  ;;  %s248_s13 = smov 8   ;;  %s190_s12 = int_to_ptr.hbm [resolvable:$true] %s189_s12 }
   0x8   :  { %59 = vmatpush.bf16.msra.mxu0 %v42_v7  ;;  %91 = vmatpush.bf16.msra.mxu1 %v82_v11  ;;  %v80_v17 = vpack.c.bf16 %v74_v16, %v73_v15  ;;  %v79_v20 = vpack.c.bf16 %v72_v19, %v71_v18  ;;  %v208_v23 = vld [vmem:[%s359_s2] ss:$0 sm:$0xff] }
   0x9   :  { %v209_v34 = vld [vmem:[%s361_s4] ss:$0 sm:$0xff] }
   0xa   :  { %v210_v12 = vld [vmem:[%s362_s5] ss:$0 sm:$0xff]  ;;  %s246_s5 = smov [#allocation3]  }
   0xb   :  { %201 = vmatmul.msk.bf16.vlgmr.msra.gmra.mxu0 %vm32_vm0, %v37_v8  ;;  %v211_v16 = vld [vmem:[%s363_s6] ss:$0 sm:$0xff]  ;;  %s187_s9 = sshll.u32 %s246_s5, 4  ;;  %s247_s6 = smov 128   ;;  %s188_s9 = int_to_ptr.vmem [resolvable:$true] %s187_s9 }
   0xc   :  { %92 = vmatpush.bf16.msra.mxu1 %v81_v14 }
   0xd   :  { %v68_v30 = vld [vmem:[#allocation2] sm:$0xff]  ;;  %v213_v46 = vpop.eup %212 }
   0xe   :  { %v69_v33 = vld [vmem:[#allocation2 + $0x8] sm:$0xff]  ;;  %v127_v47 = vmul.f32 32.0, %v213_v46  ;;  %vm131_vm2 = vweird.f32 %v213_v46 }
  0x10   :  { %93 = vmatpush.bf16.msra.mxu1 %v80_v17  ;;  %v128_v48 = vsub.f32 1.0, %v127_v47 }
  0x12   :  { %v129_v49 = vmul.f32 %v213_v46, %v128_v48 }
  0x14   :  { %94 = vmatpush.bf16.msra.mxu1 %v79_v20  ;;  %v130_v50 = vadd.f32 %v213_v46, %v129_v49 }
  0x16   :  { %v132_v51 = vsel %vm131_vm2, %v213_v46, %v130_v50 }
  0x88   :  { %v61_v22 = vpop.f32.mrf.mxu0 }
  0x89   :  { %v62_v24 = vadd.f32 %v208_v23, %v61_v22 }
  0x8b   :  { %v66_v27 = vmax.f32 %v62_v24, 0.0 }
  0x90   :  { %v63_v25 = vpop.f32.mrf.mxu0 }
  0x91   :  { %v64_v26 = vadd.f32 %v208_v23, %v63_v25 }
  0x93   :  { %v67_v28 = vmax.f32 %v64_v26, 0.0 }
  0x95   :  { %v70_v29 = vpack.c.bf16 %v67_v28, %v66_v27 }
  0x97   :  { %202 = vmatmul.msk.bf16.vlgmr.msra.gmra.mxu1 %vm83_vm1, %v70_v29 }
 0x114   :  { %v96_v31 = vpop.f32.mrf.mxu1 }
 0x115   :  { %v101_v32 = vadd.f32 %v96_v31, %v68_v30 }
 0x117   :  { %103 = vst.msk [vmem:[#allocation2] sm:$0xff] %vm32_vm0, %v101_v32 }
 0x11c   :  { %v98_v35 = vpop.f32.mrf.mxu1 }
 0x11d   :  { %v102_v36 = vadd.f32 %v98_v35, %v69_v33 }
 0x11e   :  { %v108_v37 = vld [vmem:[#allocation2] sm:$0xff] }
 0x11f   :  { %104 = vst.msk [vmem:[#allocation2 + $0x8] sm:$0xff] %vm32_vm0, %v102_v36  ;;  %v114_v38 = vadd.f32 %v209_v34, %v108_v37 }
 0x121   :  { %v116_v39 = vadd.f32 %v114_v38, %v35_v5 }
 0x123   :  { %v120_v40 = vsel %vm32_vm0, %v116_v39, 0.0 }
 0x124   :  { %121 = vadd.xlane.f32.xlu0 %v120_v40 }
 0x126   :  { %v109_v41 = vld [vmem:[#allocation2 + $0x8] sm:$0xff] }
 0x127   :  { %v115_v42 = vadd.f32 %v209_v34, %v109_v41 }
 0x129   :  { %v117_v43 = vadd.f32 %v115_v42, %v36_v6 }
 0x12b   :  { %v123_v44 = vsel %vm32_vm0, %v117_v43, 0.0 }
 0x12c   :  { %124 = vadd.xlane.f32.xlu0 %v123_v44 }
 0x197   :  { %v122_v52 = vpop.xlane.xlu0 %121 }
 0x198   :  { %v133_v53 = vmul.f32 %v132_v51, %v122_v52 }
 0x19a   :  { %v135_v54 = vsub.f32 %v116_v39, %v133_v53 }
 0x19c   :  { %v137_v55 = vmul.f32 %v135_v54, %v135_v54 }
 0x19e   :  { %v139_v56 = vsel %vm32_vm0, %v137_v55, 0.0 }
 0x19f   :  { %140 = vadd.xlane.f32.xlu1 %v139_v56  ;;  %v125_v57 = vpop.xlane.xlu0 %124 }
 0x1a0   :  { %v134_v58 = vmul.f32 %v132_v51, %v125_v57 }
 0x1a2   :  { %v136_v59 = vsub.f32 %v117_v43, %v134_v58 }
 0x1a4   :  { %v138_v60 = vmul.f32 %v136_v59, %v136_v59 }
 0x1a6   :  { %v142_v61 = vsel %vm32_vm0, %v138_v60, 0.0 }
 0x1a7   :  { %143 = vadd.xlane.f32.xlu1 %v142_v61 }
 0x212   :  { %v141_v62 = vpop.xlane.xlu1 %140 }
 0x213   :  { %v145_v63 = vmul.f32 %v141_v62, %v132_v51 }
 0x215   :  { %v147_v0 = vadd.f32 1e-05, %v145_v63 }
 0x217   :  { %214 = vrsqrt.f32 %v147_v0  ;;  %vm155_vm4 = vweird.f32 %v147_v0 }
 0x21a   :  { %v144_v1 = vpop.xlane.xlu1 %143 }
 0x21b   :  { %v146_v2 = vmul.f32 %v144_v1, %v132_v51 }
 0x21d   :  { %v215_v3 = vpop.eup %214  ;;  %v148_v4 = vadd.f32 1e-05, %v146_v2 }
 0x21e   :  { %v150_v5 = vmul.f32 %v215_v3, %v147_v0  ;;  %vm156_vm3 = vweird.f32 %v215_v3 }
 0x21f   :  { %216 = vrsqrt.f32 %v148_v4  ;;  %vm157_vm5 = vmor %vm155_vm4, %vm156_vm3  ;;  %vm165_vm7 = vweird.f32 %v148_v4 }
 0x220   :  { %v151_v6 = vmul.f32 %v215_v3, %v150_v5 }
 0x222   :  { %v152_v7 = vmul.f32 0.5, %v151_v6 }
 0x224   :  { %v153_v8 = vsub.f32 1.5, %v152_v7 }
 0x225   :  { %v217_v9 = vpop.eup %216 }
 0x226   :  { %v154_v10 = vmul.f32 %v215_v3, %v153_v8  ;;  %v160_v11 = vmul.f32 %v217_v9, %v148_v4  ;;  %vm166_vm6 = vweird.f32 %v217_v9 }
 0x227   :  { %vm167_vm8 = vmor %vm165_vm7, %vm166_vm6 }
 0x228   :  { %v158_v13 = vsel %vm157_vm5, %v215_v3, %v154_v10  ;;  %v161_v14 = vmul.f32 %v217_v9, %v160_v11 }
 0x229   :  { %v169_v15 = vmul.f32 %v158_v13, %v135_v54 }
 0x22a   :  { %v162_v17 = vmul.f32 0.5, %v161_v14 }
 0x22b   :  { %v174_v18 = vmul.f32 %v210_v12, %v169_v15 }
 0x22c   :  { %v163_v19 = vsub.f32 1.5, %v162_v17 }
 0x22d   :  { %v179_v20 = vadd.f32 %v211_v16, %v174_v18 }
 0x22e   :  { %v164_v21 = vmul.f32 %v217_v9, %v163_v19 }
 0x22f   :  { %181 = vst.msk [vmem:[#allocation3] sm:$0xff] %vm32_vm0, %v179_v20 }
 0x230   :  { %v168_v22 = vsel %vm167_vm8, %v217_v9, %v164_v21 }
 0x231   :  { %v170_v23 = vmul.f32 %v168_v22, %v136_v59 }
 0x233   :  { %v175_v24 = vmul.f32 %v210_v12, %v170_v23 }
 0x235   :  { %v180_v25 = vadd.f32 %v211_v16, %v175_v24 }
 0x237   :  { %182 = vst.msk [vmem:[#allocation3 + $0x8] sm:$0xff] %vm32_vm0, %v180_v25 }
 0x238   :  { %195 = dma.vmem_to_hbm [thread:$0]  %s188_s9, 256, %s190_s12, [#allocation4], %s247_s6, %s247_s6, %s248_s13  }
 0x239   :  { %242 = dma.done.wait [#allocation4], 256  }
 0x23a   :  { %243 = vsyncadd [#allocation4], 4294967040 }
 0x23b   :  { %200 = vsyncpa [#allocation4], 1 }

// kernel: _lambda_.16
= control target key start
LH: loop header
LB: loop body
LE: loop exit
PB: predicated region body
PF: predicated region fallthrough
CT: control target
= control target key end

     0   :  { %s866_s27 = smov 0   ;;  %s868_s28 = smov 0   ;;  %s977_s0 = inlined_call_operand.vmem [shape: f32[2,4,8,8], index: 0, kind: input, shape index: {}]   ;;  %s978_s1 = inlined_call_operand.vmem [shape: f32[2,4,8,8], index: 1, kind: input, shape index: {}]   ;;  %s979_s2 = inlined_call_operand.vmem [shape: f32[2,4,8,8], index: 2, kind: input, shape index: {}]   ;;  %s980_s3 = inlined_call_operand.vmem [shape: f32[4,8,32], index: 3, kind: input, shape index: {}]   ;;  %s981_s4 = inlined_call_operand.vmem [shape: f32[1,32], index: 4, kind: input, shape index: {}]   ;;  %s982_s5 = inlined_call_operand.vmem [shape: f32[2,8,32], index: 5, kind: input, shape index: {}]   ;;  %s983_s6 = inlined_call_operand.vmem [shape: f32[1,32], index: 6, kind: input, shape index: {}]   ;;  %s984_s7 = inlined_call_operand.vmem [shape: f32[1,32], index: 7, kind: input, shape index: {}]   ;;  %s985_s8 = inlined_call_operand.vmem [shape: f32[2,8,32], index: 8, kind: output, shape index: {}]  }
   0x1   :  { %s870_s29 = smov 0   ;;  %s872_s30 = smov 0  }
   0x2   :  { %s874_s9 = smov 0  }
   0x3 LB: > { %s30_s10 = sadd.s32 1, %s809_s29  ;;  %s37_s11 = sadd.s32 1, %s813_s30  ;;  %s817_s9 = sphi %s874_s9, %s18_s9   ;;  %s813_s30 = sphi %s872_s30, %s991_s30   ;;  %s809_s29 = sphi %s870_s29, %s990_s29   ;;  %s805_s28 = sphi %s868_s28, %s989_s28   ;;  %s801_s27 = sphi %s866_s27, %s988_s27  }
   0x4   : > { %p31_p0 = scmp.ge.s32.totalorder %s30_s10, 4  ;;  %p706_p1 = scmp.ge.s32.totalorder %s817_s9, 1 }
   0x5   : > { %p322_p2 = scmp.lt.s32.totalorder %s817_s9, 9 }
   0x6   : > { %s993_s10 = smov (%p31_p0, %s30_s10), 0  ;;  %s995_s11 = smov (!%p31_p0, %s37_s11), %s813_s30 }
   0x7   : > { %p323_p3 = pnand %p706_p1, %p322_p2  ;;  %p39_p4 = scmp.ge.s32.totalorder %s995_s11, 2 }
   0x8   : > { %p378_p5 = scmp.lt.s32.totalorder (!%p323_p3), %s805_s28, 1  ;;  %p715_p6 = scmp.ne.s32.totalorder (!%p323_p3), %s801_s27, 0 }
   0x9   : > { %s997_s11 = smov (%p39_p4, %s995_s11), 0  ;;  %326 = sbr.rel (%p323_p3) target bundleno = 969 (0x3c9), region = 52 }
   0xa   : > { %986 = sst [smem:[#allocation3_spill]] %s997_s11 }
   0xe   : > { %s999_s28 = smov (!%p378_p5, %s805_s28), 1  ;;  %414 = sbr.rel (%p715_p6) target bundleno = 21 (0x15), region = 56 }
   0xf   : > { %s898_s12 = sshll.u32 %s999_s28, 5  ;;  %s713_s13 = sshll.u32 %s999_s28, 3 }
  0x10   : > { %s385_s16 = scalar_lea.vmem %s977_s0, %s898_s12  ;;  %s390_s19 = scalar_lea.vmem %s978_s1, %s898_s12 }
  0x11   : > { %s395_s22 = scalar_lea.vmem %s979_s2, %s898_s12  ;;  %s915_s25 = scalar_lea.vmem %s982_s5, %s713_s13 }
  0x12   : > { %s920_s28 = scalar_lea.vmem %s985_s8, %s713_s13 }
  0x13   : > { %vm415_vm0 = vcmask 261120   ;;  %v819_v0 = vmov 0.0  }
  0x14   : > { %416 = vst.msk [vmem:[#allocation2] sm:$0xff] %vm415_vm0, %v819_v0 }
  0x15 PF: > { %s924_s14 = sshll.u32 %s801_s27, 3  ;;  %vm428_vm1 = vcmask 64512   ;;  %vm476_vm2 = vcmask 1043456   ;;  %vm518_vm7 = vcmask 261120   ;;  %p720_p7 = scmp.ne.s32.totalorder %s801_s27, 3 }
  0x16   : > { %s422_s15 = scalar_lea.vmem %s390_s19, %s924_s14  ;;  %s418_s17 = scalar_lea.vmem %s385_s16, %s924_s14 }
  0x17   : > { %v423_v1 = vld [vmem:[%s422_s15] sm:$0xff]  ;;  %s425_s16 = scalar_lea.vmem %s395_s22, %s924_s14  ;;  %s495_s19 = scalar_lea.vmem %s980_s3, %s924_s14 }
  0x18   : > { %v419_v2 = vld [vmem:[%s418_s17] sm:$0xff]  ;;  %v424_v3 = vpack.c.bf16 %v423_v1, %v423_v1 }
  0x19   : > { %v420_v5 = vmul.f32 0.35355338, %v419_v2  ;;  %v426_v15 = vld [vmem:[%s425_s16] sm:$0xff] }
  0x1a   : > { %v433_v4 = vsel %vm428_vm1, %v424_v3, 0  ;;  %v427_v16 = vpack.c.bf16 %v426_v15, %v426_v15  ;;  %v496_v31 = vld [vmem:[%s495_s19] sm:$0xff] }
  0x1b   : > { %442 = vmatpush.bf16.xpose.msra.mxu0 %v433_v4  ;;  %v421_v6 = vpack.c.bf16 %v420_v5, %v420_v5  ;;  %v497_v32 = vpack.c.bf16 %v496_v31, %v496_v31  ;;  %v493_v37 = vld [vmem:[#allocation2] sm:$0xff] }
  0x1c   : > { %v478_v17 = vsel %vm476_vm2, %v427_v16, 0 }
  0x1d   : > { %487 = vmatpush.bf16.msra.mxu1 %v478_v17  ;;  %v502_v33 = vsel %vm476_vm2, %v497_v32, 0 }
  0x1e   : > { %511 = vmatpush.bf16.msra.mxu2 %v502_v33 }
  0x22   : > { %717 = vmatmul.msk.bf16.vlgmr.msra.gmra.mxu0 %vm428_vm1, %v421_v6 }
  0x9f   : > { %v444_v7 = vpop.f32.mrf.mxu0 }
  0xa0   : > { %v448_v8 = vsel %vm428_vm1, %v444_v7, -inf }
  0xa1   : > { %449 = vmax.xlane.f32.xlu0 %v448_v8 }
  0xa7   : > { %v446_v9 = vpop.f32.mrf.mxu0 }
 0x114   : > { %v450_v10 = vpop.xlane.xlu0 %449 }
 0x115   : > { %v451_v11 = vsub.f32 %v444_v7, %v450_v10 }
 0x117   : > { %v452_v12 = vmul.f32 1.442695, %v451_v11 }
 0x119   : > { %768 = vpow2.f32 %v452_v12 }
 0x11f   : > { %v769_v13 = vpop.eup %768 }
 0x120   : > { %v454_v14 = vsel %vm428_vm1, %v769_v13, 0.0 }
 0x121   : > { %455 = vadd.xlane.f32.xlu0 %v454_v14 }
 0x194   : > { %v456_v18 = vpop.xlane.xlu0 %455 }
 0x195   : > { %770 = vrcp.f32 %v456_v18  ;;  %v468_v22 = vand.u32 2147483648, %v456_v18  ;;  %v466_v24 = vand.u32 2147483647, %v456_v18  ;;  %vm462_vm4 = vweird.f32 %v456_v18 }
 0x197   : > { %v469_v26 = vor.u32 1.1754944e-38, %v468_v22  ;;  %vm467_vm6 = vcmp.eq.f32.partialorder %v466_v24, 8.507059e+37 }
 0x19b   : > { %v771_v19 = vpop.eup %770 }
 0x19c   : > { %v458_v20 = vmul.f32 %v771_v19, %v456_v18  ;;  %vm463_vm3 = vweird.f32 %v771_v19 }
 0x19d   : > { %vm464_vm5 = vmor %vm462_vm4, %vm463_vm3 }
 0x19e   : > { %v459_v21 = vsub.f32 1.0, %v458_v20 }
 0x1a0   : > { %v460_v23 = vmul.f32 %v771_v19, %v459_v21 }
 0x1a2   : > { %v461_v25 = vadd.f32 %v771_v19, %v460_v23 }
 0x1a4   : > { %v465_v27 = vsel %vm464_vm5, %v771_v19, %v461_v25 }
 0x1a5   : > { %v470_v28 = vsel %vm467_vm6, %v469_v26, %v465_v27 }
 0x1a6   : > { %v471_v29 = vmul.f32 %v769_v13, %v470_v28 }
 0x1a8   : > { %v472_v30 = vpack.c.bf16 %v471_v29, %v471_v29 }
 0x1aa   : > { %718 = vmatmul.msk.bf16.vlgmr.msra.gmra.mxu1 %vm428_vm1, %v472_v30 }
 0x227   : > { %v489_v34 = vpop.f32.mrf.mxu1 }
 0x228   : > { %v494_v35 = vpack.c.bf16 %v489_v34, %v489_v34 }
 0x22a   : > { %719 = vmatmul.msk.bf16.vlgmr.msra.gmra.mxu2 %vm428_vm1, %v494_v35 }
 0x22f   : > { %v491_v36 = vpop.f32.mrf.mxu1 }
 0x2ad   : > { %v513_v38 = vpop.f32.mrf.mxu2 }
 0x2ae   : > { %v517_v39 = vadd.f32 %v513_v38, %v493_v37 }
 0x2b0   : > { %519 = vst.msk [vmem:[#allocation2] sm:$0xff] %vm518_vm7, %v517_v39 }
 0x2b1   : > { %523 = sbr.rel (%p720_p7) target bundleno = 969 (0x3c9), region = 60 }
 0x2b5   : > { %v515_v40 = vpop.f32.mrf.mxu2 }
 0x2b6   : > { %v772_v42 = vld [vmem:[%s981_s4] ss:$0 sm:$0xff]  ;;  %v820_v47 = vmov 32.0  }
 0x2b7   : > { %v524_v41 = vld [vmem:[#allocation2] sm:$0xff]  ;;  %775 = vrcp.f32 %v820_v47 }
 0x2b8   : > { %v530_v43 = vld [vmem:[%s915_s25] sm:$0xff]  ;;  %v529_v44 = vadd.f32 %v772_v42, %v524_v41 }
 0x2b9   : > { %v773_v4 = vld [vmem:[%s983_s6] ss:$0 sm:$0xff] }
 0x2ba   : > { %v531_v45 = vadd.f32 %v530_v43, %v529_v44  ;;  %v774_v6 = vld [vmem:[%s984_s7] ss:$0 sm:$0xff] }
 0x2bc   : > { %v534_v46 = vsel %vm518_vm7, %v531_v45, 0.0 }
 0x2bd   : > { %535 = vadd.xlane.f32.xlu0 %v534_v46  ;;  %v776_v48 = vpop.eup %775 }
 0x2be   : > { %v538_v49 = vmul.f32 32.0, %v776_v48  ;;  %vm542_vm8 = vweird.f32 %v776_v48 }
 0x2c0   : > { %v539_v50 = vsub.f32 1.0, %v538_v49 }
 0x2c2   : > { %v540_v51 = vmul.f32 %v776_v48, %v539_v50 }
 0x2c4   : > { %v541_v52 = vadd.f32 %v776_v48, %v540_v51 }
 0x2c6   : > { %v543_v53 = vsel %vm542_vm8, %v776_v48, %v541_v52 }
 0x330   : > { %v536_v54 = vpop.xlane.xlu0 %535 }
 0x331   : > { %v544_v55 = vmul.f32 %v543_v53, %v536_v54 }
 0x333   : > { %v545_v56 = vsub.f32 %v531_v45, %v544_v55 }
 0x335   : > { %v546_v57 = vmul.f32 %v545_v56, %v545_v56 }
 0x337   : > { %v547_v58 = vsel %vm518_vm7, %v546_v57, 0.0 }
 0x338   : > { %548 = vadd.xlane.f32.xlu0 %v547_v58 }
 0x3ab   : > { %v549_v59 = vpop.xlane.xlu0 %548 }
 0x3ac   : > { %v550_v60 = vmul.f32 %v549_v59, %v543_v53 }
 0x3ae   : > { %v551_v61 = vadd.f32 1e-05, %v550_v60 }
 0x3b0   : > { %777 = vrsqrt.f32 %v551_v61  ;;  %vm558_vm10 = vweird.f32 %v551_v61 }
 0x3b6   : > { %v778_v62 = vpop.eup %777 }
 0x3b7   : > { %v553_v63 = vmul.f32 %v778_v62, %v551_v61  ;;  %vm559_vm9 = vweird.f32 %v778_v62 }
 0x3b8   : > { %vm560_vm11 = vmor %vm558_vm10, %vm559_vm9 }
 0x3b9   : > { %v554_v0 = vmul.f32 %v778_v62, %v553_v63 }
 0x3bb   : > { %v555_v1 = vmul.f32 0.5, %v554_v0 }
 0x3bd   : > { %v556_v2 = vsub.f32 1.5, %v555_v1 }
 0x3bf   : > { %v557_v3 = vmul.f32 %v778_v62, %v556_v2 }
 0x3c1   : > { %v561_v5 = vsel %vm560_vm11, %v778_v62, %v557_v3 }
 0x3c2   : > { %v562_v7 = vmul.f32 %v561_v5, %v545_v56 }
 0x3c4   : > { %v566_v8 = vmul.f32 %v773_v4, %v562_v7 }
 0x3c6   : > { %v570_v9 = vadd.f32 %v774_v6, %v566_v8 }
 0x3c8   : > { %571 = vst.msk [vmem:[%s920_s28] sm:$0xff] %vm518_vm7, %v570_v9 }
 0x3c9 PF: > { %s18_s9 = sadd.s32 1, %s817_s9   ;;  %s987_s25 = sld [smem:[#allocation3_spill]] }
 0x3ca   : > { %p15_p8 = scmp.ge.s32.totalorder %s18_s9, 10   ;;  %s988_s27 = smov %s809_s29 }
 0x3cb   : > { %s989_s28 = smov %s813_s30  ;;  %s990_s29 = smov %s993_s10 }
 0x3cc   :  { %17 = sbr.rel (!%p15_p8) target bundleno = 3 (0x3), region = 103 }
 0x3cf   : > { %s991_s30 = smov %s987_s25 }

</bundles_post_ra>
